<compile_context>
chip_gen: v7x
topology: tpu7x:2x2x1
jax: 0.10.0
libtpu: 0.0.40
codegen_flags: <defaults>
</compile_context>

<pallas_src>
import jax
import jax.numpy as jnp
from jax import lax
from jax.experimental import pallas as pl
from jax.experimental.pallas import tpu as pltpu

B = 2            # batch
H = W = 8        # spatial (fixed by fc1_v = Linear(8*8*1, 256))
HW = H * W
CIN = 256        # input channels (fixed by conv1_p)
CMID = 256
CPOL = 73
POL_PAD = 128            # policy logits padded to a lane-dense 128-wide slab
W1_COLS = CMID + 128     # [conv1_p (256) | fused conv_v col | zero pad] -> 384
EPS = 1e-5
NEG_INF = -1e30


def outblock_kernel(x_ref, w1_ref, sp_ref, bp_ref, wp2_ref,
                    fc1w_ref, fc1b_ref, fc2w_ref, fc2b_ref,
                    p_ref, v_ref):
    bs, hw, cin = x_ref.shape
    xm = x_ref[...].reshape(bs * hw, cin)                       # (bs*HW, 256) bf16

    # Fused conv1_p + conv_v: one MXU pass over a full-height LHS.
    acc = jnp.dot(xm, w1_ref[...],
                  preferred_element_type=jnp.float32)           # (bs*HW, 384) f32
    # Folded BN (eval mode) scale/bias + relu for both heads in one pass.
    h_all = jnp.maximum(acc * sp_ref[...] + bp_ref[...], 0.0)

    # ---------------- policy head ----------------
    hp = h_all[:, :CMID].astype(wp2_ref.dtype)                  # (bs*HW, 256) bf16
    logits = jnp.dot(hp, wp2_ref[...],
                     preferred_element_type=jnp.float32)        # (bs*HW, 128) lane-dense
    logits = logits.reshape(bs, hw, POL_PAD)
    col = lax.broadcasted_iota(jnp.int32, (bs, hw, POL_PAD), 2)
    logits = jnp.where(col < CPOL, logits, NEG_INF)             # mask padded lanes

    # per-sample log-softmax over all 73*64 logits (keepdims -> stays in vregs)
    m = jnp.max(jnp.max(logits, axis=2, keepdims=True), axis=1, keepdims=True)
    z = logits - m
    ssum = jnp.sum(jnp.sum(jnp.exp(z), axis=2, keepdims=True),
                   axis=1, keepdims=True)
    p_ref[...] = z - jnp.log(ssum)                              # (bs, HW, 128)

    # ---------------- value head ----------------
    vb = h_all[:, CMID:CMID + 1]                                # (bs*HW, 1), BN+relu done
    vb3 = vb.reshape(bs, hw, 1)
    # fc1_v as broadcast-multiply + sublane reduce (avoids a minor-dim relayout)
    h1 = jnp.sum(vb3 * fc1w_ref[...][None, :, :], axis=1)       # (bs, 256)
    h1 = jnp.maximum(h1 + fc1b_ref[...], 0.0)
    # fc2_v as VPU multiply + lane reduce (no 1-wide MXU pass)
    vo = jnp.sum(h1 * fc2w_ref[...], axis=1, keepdims=True) + fc2b_ref[...]
    v_ref[...] = jnp.tanh(vo)                                   # (bs, 1)


def outblock_forward(x_nchw, packed, samples_per_block=2):
    """x_nchw: (B, 256, 8, 8) f32. Returns (p_log (B, 73*64), v (B,))."""
    b = x_nchw.shape[0]
    bs = min(samples_per_block, b)
    assert b % bs == 0, "batch must divide into sample chunks"
    # NCHW -> (B, H*W, C), bf16 matmul operand (halves x DMA bytes).
    x = jnp.transpose(x_nchw, (0, 2, 3, 1)).reshape(b, HW, CIN).astype(jnp.bfloat16)
    (w1c, sp_ext, bp_ext, wp2_pad, fc1w, fc1b, fc2w, fc2b) = packed

    const2d = lambda shp: pl.BlockSpec(shp, lambda c: (0, 0))

    p_pad, v_out = pl.pallas_call(
        outblock_kernel,
        out_shape=(
            jax.ShapeDtypeStruct((b, HW, POL_PAD), jnp.float32),
            jax.ShapeDtypeStruct((b, 1), jnp.float32),
        ),
        grid_spec=pltpu.PrefetchScalarGridSpec(
            num_scalar_prefetch=0,
            grid=(b // bs,),
            in_specs=[
                pl.BlockSpec((bs, HW, CIN), lambda c: (c, 0, 0)),  # x chunk
                const2d((CIN, W1_COLS)),                           # fused conv1_p|conv_v
                const2d((1, W1_COLS)),                             # folded BN scale
                const2d((1, W1_COLS)),                             # folded BN bias
                const2d((CMID, POL_PAD)),                          # conv2_p (padded)
                const2d((HW, 256)),                                # fc1_v weight
                const2d((1, 256)),                                 # fc1_v bias
                const2d((1, 256)),                                 # fc2_v weight (row)
                const2d((1, 1)),                                   # fc2_v bias
            ],
            out_specs=[
                pl.BlockSpec((bs, HW, POL_PAD), lambda c: (c, 0, 0)),
                pl.BlockSpec((bs, 1), lambda c: (c, 0)),
            ],
        ),
        compiler_params=pltpu.CompilerParams(
            dimension_semantics=("parallel",)),
    )(x, w1c, sp_ext, bp_ext, wp2_pad, fc1w, fc1b, fc2w, fc2b)

    # slice off the padded lanes and match PyTorch's NCHW flatten (B,73,64)->(B,4672)
    p_log = jnp.transpose(p_pad[..., :CPOL], (0, 2, 1)).reshape(b, CPOL * HW)
    v = v_out.reshape(b)
    return p_log, v


# ----------------------------------------------------------------------------
# Parameters: raw (PyTorch-layout) params + packing into kernel operands.
# ----------------------------------------------------------------------------
def make_raw_params(key):
    ks = jax.random.split(key, 12)
    sc = 0.05
    return dict(
        w1=jax.random.normal(ks[0], (CMID, CIN), jnp.float32) * sc,    # conv1_p (out,in)
        w2=jax.random.normal(ks[1], (CPOL, CMID), jnp.float32) * sc,   # conv2_p (out,in)
        wv=jax.random.normal(ks[2], (1, CIN), jnp.float32) * sc,       # conv_v  (out,in)
        bn_p_gamma=1.0 + 0.1 * jax.random.normal(ks[3], (CMID,), jnp.float32),
        bn_p_beta=0.1 * jax.random.normal(ks[4], (CMID,), jnp.float32),
        bn_p_mean=0.1 * jax.random.normal(ks[5], (CMID,), jnp.float32),
        bn_p_var=jnp.abs(1.0 + 0.1 * jax.random.normal(ks[6], (CMID,), jnp.float32)),
        bn_v_gamma=jnp.array([1.1], jnp.float32),
        bn_v_beta=jnp.array([0.05], jnp.float32),
        bn_v_mean=jnp.array([0.02], jnp.float32),
        bn_v_var=jnp.array([0.9], jnp.float32),
        fc1_w=jax.random.normal(ks[7], (256, HW), jnp.float32) * sc,   # torch (out,in)
        fc1_b=0.1 * jax.random.normal(ks[8], (256,), jnp.float32),
        fc2_w=jax.random.normal(ks[9], (1, 256), jnp.float32) * sc,
        fc2_b=0.1 * jax.random.normal(ks[10], (1,), jnp.float32),
    )


def pack_params(raw):
    # Fold BatchNorm (eval mode, running stats) into per-channel scale/bias.
    sp = raw["bn_p_gamma"] / jnp.sqrt(raw["bn_p_var"] + EPS)
    bp = raw["bn_p_beta"] - raw["bn_p_mean"] * sp
    sv = raw["bn_v_gamma"] / jnp.sqrt(raw["bn_v_var"] + EPS)           # (1,)
    bv = raw["bn_v_beta"] - raw["bn_v_mean"] * sv                      # (1,)

    wp1 = raw["w1"].T                                                  # (CIN, CMID)
    wv_s = raw["wv"].T * sv                                            # (CIN, 1), bn_v scale folded
    w1c = jnp.zeros((CIN, W1_COLS), jnp.float32)
    w1c = w1c.at[:, :CMID].set(wp1)
    w1c = w1c.at[:, CMID:CMID + 1].set(wv_s)

    sp_ext = jnp.zeros((1, W1_COLS), jnp.float32)
    sp_ext = sp_ext.at[0, :CMID].set(sp).at[0, CMID].set(1.0)
    bp_ext = jnp.zeros((1, W1_COLS), jnp.float32)
    bp_ext = bp_ext.at[0, :CMID].set(bp).at[0, CMID].set(bv[0])

    wp2_pad = jnp.zeros((CMID, POL_PAD), jnp.float32).at[:, :CPOL].set(raw["w2"].T)

    fc1w = raw["fc1_w"].T                                              # (HW, 256)
    fc1b = raw["fc1_b"].reshape(1, 256)
    fc2w = raw["fc2_w"].reshape(1, 256)
    fc2b = raw["fc2_b"].reshape(1, 1)
    return (w1c.astype(jnp.bfloat16), sp_ext, bp_ext,
            wp2_pad.astype(jnp.bfloat16), fc1w, fc1b, fc2w, fc2b)


def reference_forward(x_nchw, raw):
    """Pure-JAX f32 reference matching the PyTorch module (BN in eval mode)."""
    b = x_nchw.shape[0]
    x = jnp.transpose(x_nchw, (0, 2, 3, 1)).reshape(b, HW, CIN)
    p = jnp.einsum("bsc,oc->bso", x, raw["w1"])
    p = (p - raw["bn_p_mean"]) * (raw["bn_p_gamma"] /
                                  jnp.sqrt(raw["bn_p_var"] + EPS)) + raw["bn_p_beta"]
    p = jnp.maximum(p, 0.0)
    logits = jnp.einsum("bsc,oc->bso", p, raw["w2"])                   # (B, 64, 73)
    flat = jnp.transpose(logits, (0, 2, 1)).reshape(b, -1)             # NCHW flatten order
    p_log = jax.nn.log_softmax(flat, axis=1)

    v = jnp.einsum("bsc,oc->bso", x, raw["wv"])                        # (B, 64, 1)
    v = (v - raw["bn_v_mean"]) * (raw["bn_v_gamma"] /
                                  jnp.sqrt(raw["bn_v_var"] + EPS)) + raw["bn_v_beta"]
    v = jnp.maximum(v, 0.0).reshape(b, HW)
    h1 = jnp.maximum(v @ raw["fc1_w"].T + raw["fc1_b"], 0.0)
    vout = jnp.tanh(h1 @ raw["fc2_w"].T + raw["fc2_b"]).reshape(-1)
    return p_log, vout


if __name__ == "__main__":
    key = jax.random.PRNGKey(0)
    kx, kp = jax.random.split(key)
    x = jax.random.normal(kx, (B, CIN, H, W), jnp.float32)   # NCHW, like PyTorch
    raw = make_raw_params(kp)
    packed = pack_params(raw)

    p_log, v = outblock_forward(x, packed)
    jax.block_until_ready((p_log, v))

    p_ref, v_ref = reference_forward(x, raw)
    assert p_log.shape == (B, CPOL * HW) and v.shape == (B,)
    # bf16 matmul operands -> loosened tolerance vs. the f32 reference.
    assert jnp.allclose(p_log, p_ref, atol=5e-2, rtol=5e-2), \
        float(jnp.max(jnp.abs(p_log - p_ref)))
    assert jnp.allclose(v, v_ref, atol=5e-2, rtol=5e-2), \
        float(jnp.max(jnp.abs(v - v_ref)))
    print("KERNEL_OK")
</pallas_src>

<mosaic_0001>
module attributes {stable_mosaic.version = 11 : i64} {
  func.func @outblock_kernel(%arg0: i32, %arg1: memref<2x64x256xbf16, #tpu.memory_space<vmem>>, %arg2: memref<256x384xbf16, #tpu.memory_space<vmem>>, %arg3: memref<1x384xf32, #tpu.memory_space<vmem>>, %arg4: memref<1x384xf32, #tpu.memory_space<vmem>>, %arg5: memref<256x128xbf16, #tpu.memory_space<vmem>>, %arg6: memref<64x256xf32, #tpu.memory_space<vmem>>, %arg7: memref<1x256xf32, #tpu.memory_space<vmem>>, %arg8: memref<1x256xf32, #tpu.memory_space<vmem>>, %arg9: memref<1x1xf32, #tpu.memory_space<vmem>>, %arg10: memref<2x64x128xf32, #tpu.memory_space<vmem>>, %arg11: memref<2x1xf32, #tpu.memory_space<vmem>>) attributes {dimension_semantics = [#tpu.dimension_semantics<parallel>], iteration_bounds = array<i64: 1>, scalar_prefetch = 0 : i64, scratch_operands = 0 : i64, tpu.core_type = #tpu.core_type<tc>, window_params = [{transform_indices = @transform_0, window_bounds = array<i64: 2, 64, 256>}, {pipeline_mode = #tpu.pipeline_mode<synchronous>, transform_indices = @transform_1, window_bounds = array<i64: 256, 384>}, {pipeline_mode = #tpu.pipeline_mode<synchronous>, transform_indices = @transform_2, window_bounds = array<i64: 1, 384>}, {pipeline_mode = #tpu.pipeline_mode<synchronous>, transform_indices = @transform_3, window_bounds = array<i64: 1, 384>}, {pipeline_mode = #tpu.pipeline_mode<synchronous>, transform_indices = @transform_4, window_bounds = array<i64: 256, 128>}, {pipeline_mode = #tpu.pipeline_mode<synchronous>, transform_indices = @transform_5, window_bounds = array<i64: 64, 256>}, {pipeline_mode = #tpu.pipeline_mode<synchronous>, transform_indices = @transform_6, window_bounds = array<i64: 1, 256>}, {pipeline_mode = #tpu.pipeline_mode<synchronous>, transform_indices = @transform_7, window_bounds = array<i64: 1, 256>}, {pipeline_mode = #tpu.pipeline_mode<synchronous>, transform_indices = @transform_8, window_bounds = array<i64: 1, 1>}, {transform_indices = @transform_9, window_bounds = array<i64: 2, 64, 128>}, {transform_indices = @transform_10, window_bounds = array<i64: 2, 1>}]} {
    %c0 = arith.constant 0 : index
    %c0_0 = arith.constant 0 : index
    %c0_1 = arith.constant 0 : index
    %0 = vector.load %arg1[%c0, %c0_0, %c0_1] : memref<2x64x256xbf16, #tpu.memory_space<vmem>>, vector<2x64x256xbf16>
    %1 = vector.shape_cast %0 : vector<2x64x256xbf16> to vector<128x256xbf16>
    %c0_2 = arith.constant 0 : index
    %c0_3 = arith.constant 0 : index
    %2 = vector.load %arg2[%c0_2, %c0_3] : memref<256x384xbf16, #tpu.memory_space<vmem>>, vector<256x384xbf16>
    %cst = arith.constant dense<0.000000e+00> : vector<128x384xf32>
    %3 = tpu.matmul %1, %2, %cst {dimension_numbers = #tpu.dot_dimension_numbers<[1], [0], [0], [1], [0, 0, 1, 1], [], []>} : vector<128x256xbf16>, vector<256x384xbf16>, vector<128x384xf32> -> vector<128x384xf32>
    %c0_4 = arith.constant 0 : index
    %c0_5 = arith.constant 0 : index
    %4 = vector.load %arg3[%c0_4, %c0_5] : memref<1x384xf32, #tpu.memory_space<vmem>>, vector<1x384xf32>
    %5 = vector.broadcast %4 : vector<1x384xf32> to vector<128x384xf32>
    %6 = arith.mulf %3, %5 : vector<128x384xf32>
    %c0_6 = arith.constant 0 : index
    %c0_7 = arith.constant 0 : index
    %7 = vector.load %arg4[%c0_6, %c0_7] : memref<1x384xf32, #tpu.memory_space<vmem>>, vector<1x384xf32>
    %8 = vector.broadcast %7 : vector<1x384xf32> to vector<128x384xf32>
    %9 = arith.addf %6, %8 : vector<128x384xf32>
    %cst_8 = arith.constant 0.000000e+00 : f32
    %10 = vector.broadcast %cst_8 : f32 to vector<128x384xf32>
    %11 = arith.maximumf %9, %10 : vector<128x384xf32>
    %12 = vector.extract_strided_slice %11 {offsets = [0, 0], sizes = [128, 256], strides = [1, 1]} : vector<128x384xf32> to vector<128x256xf32>
    %13 = arith.truncf %12 : vector<128x256xf32> to vector<128x256xbf16>
    %c0_9 = arith.constant 0 : index
    %c0_10 = arith.constant 0 : index
    %14 = vector.load %arg5[%c0_9, %c0_10] : memref<256x128xbf16, #tpu.memory_space<vmem>>, vector<256x128xbf16>
    %cst_11 = arith.constant dense<0.000000e+00> : vector<128x128xf32>
    %15 = tpu.matmul %13, %14, %cst_11 {dimension_numbers = #tpu.dot_dimension_numbers<[1], [0], [0], [1], [0, 0, 1, 1], [], []>} : vector<128x256xbf16>, vector<256x128xbf16>, vector<128x128xf32> -> vector<128x128xf32>
    %16 = vector.shape_cast %15 : vector<128x128xf32> to vector<2x64x128xf32>
    %17 = tpu.iota {dimensions = array<i32: 2>} : vector<2x64x128xi32>
    %c73_i32 = arith.constant 73 : i32
    %18 = vector.broadcast %c73_i32 : i32 to vector<2x64x128xi32>
    %19 = arith.cmpi slt, %17, %18 : vector<2x64x128xi32>
    %cst_12 = arith.constant -1.000000e+30 : f32
    %20 = vector.broadcast %cst_12 : f32 to vector<2x64x128xf32>
    %21 = arith.select %19, %16, %20 : vector<2x64x128xi1>, vector<2x64x128xf32>
    %cst_13 = arith.constant dense<0xFF800000> : vector<2x64xf32>
    %22 = vector.multi_reduction <maximumf>, %21, %cst_13 [2] : vector<2x64x128xf32> to vector<2x64xf32>
    %23 = vector.shape_cast %22 : vector<2x64xf32> to vector<2x64x1xf32>
    %cst_14 = arith.constant dense<0xFF800000> : vector<2x1xf32>
    %24 = vector.multi_reduction <maximumf>, %23, %cst_14 [1] : vector<2x64x1xf32> to vector<2x1xf32>
    %25 = vector.shape_cast %24 : vector<2x1xf32> to vector<2x1x1xf32>
    %26 = vector.broadcast %25 : vector<2x1x1xf32> to vector<2x64x128xf32>
    %27 = arith.subf %21, %26 : vector<2x64x128xf32>
    %28 = math.exp %27 : vector<2x64x128xf32>
    %cst_15 = arith.constant dense<0.000000e+00> : vector<2x64xf32>
    %29 = vector.multi_reduction <add>, %28, %cst_15 [2] : vector<2x64x128xf32> to vector<2x64xf32>
    %30 = vector.shape_cast %29 : vector<2x64xf32> to vector<2x64x1xf32>
    %cst_16 = arith.constant dense<0.000000e+00> : vector<2x1xf32>
    %31 = vector.multi_reduction <add>, %30, %cst_16 [1] : vector<2x64x1xf32> to vector<2x1xf32>
    %32 = vector.shape_cast %31 : vector<2x1xf32> to vector<2x1x1xf32>
    %33 = math.log %32 : vector<2x1x1xf32>
    %34 = vector.broadcast %33 : vector<2x1x1xf32> to vector<2x64x128xf32>
    %35 = arith.subf %27, %34 : vector<2x64x128xf32>
    %c0_17 = arith.constant 0 : index
    %c0_18 = arith.constant 0 : index
    %c0_19 = arith.constant 0 : index
    %36 = vector.load %arg10[%c0_17, %c0_18, %c0_19] : memref<2x64x128xf32, #tpu.memory_space<vmem>>, vector<2x64x128xf32>
    tpu.vector_store %arg10[%c0_17, %c0_18, %c0_19], %35 {strides = array<i32>} : memref<2x64x128xf32, #tpu.memory_space<vmem>>, vector<2x64x128xf32>,
    %37 = vector.extract_strided_slice %11 {offsets = [0, 256], sizes = [128, 1], strides = [1, 1]} : vector<128x384xf32> to vector<128x1xf32>
    %38 = vector.shape_cast %37 : vector<128x1xf32> to vector<2x64x1xf32>
    %c0_20 = arith.constant 0 : index
    %c0_21 = arith.constant 0 : index
    %39 = vector.load %arg6[%c0_20, %c0_21] : memref<64x256xf32, #tpu.memory_space<vmem>>, vector<64x256xf32>
    %40 = vector.shape_cast %39 : vector<64x256xf32> to vector<1x64x256xf32>
    %41 = vector.broadcast %38 : vector<2x64x1xf32> to vector<2x64x256xf32>
    %42 = vector.broadcast %40 : vector<1x64x256xf32> to vector<2x64x256xf32>
    %43 = arith.mulf %41, %42 : vector<2x64x256xf32>
    %cst_22 = arith.constant dense<0.000000e+00> : vector<2x256xf32>
    %44 = vector.multi_reduction <add>, %43, %cst_22 [1] : vector<2x64x256xf32> to vector<2x256xf32>
    %c0_23 = arith.constant 0 : index
    %c0_24 = arith.constant 0 : index
    %45 = vector.load %arg7[%c0_23, %c0_24] : memref<1x256xf32, #tpu.memory_space<vmem>>, vector<1x256xf32>
    %46 = vector.broadcast %45 : vector<1x256xf32> to vector<2x256xf32>
    %47 = arith.addf %44, %46 : vector<2x256xf32>
    %cst_25 = arith.constant 0.000000e+00 : f32
    %48 = vector.broadcast %cst_25 : f32 to vector<2x256xf32>
    %49 = arith.maximumf %47, %48 : vector<2x256xf32>
    %c0_26 = arith.constant 0 : index
    %c0_27 = arith.constant 0 : index
    %50 = vector.load %arg8[%c0_26, %c0_27] : memref<1x256xf32, #tpu.memory_space<vmem>>, vector<1x256xf32>
    %51 = vector.broadcast %50 : vector<1x256xf32> to vector<2x256xf32>
    %52 = arith.mulf %49, %51 : vector<2x256xf32>
    %cst_28 = arith.constant dense<0.000000e+00> : vector<2xf32>
    %53 = vector.multi_reduction <add>, %52, %cst_28 [1] : vector<2x256xf32> to vector<2xf32>
    %54 = vector.shape_cast %53 : vector<2xf32> to vector<2x1xf32>
    %c0_29 = arith.constant 0 : index
    %c0_30 = arith.constant 0 : index
    %55 = vector.load %arg9[%c0_29, %c0_30] : memref<1x1xf32, #tpu.memory_space<vmem>>, vector<1x1xf32>
    %56 = vector.broadcast %55 : vector<1x1xf32> to vector<2x1xf32>
    %57 = arith.addf %54, %56 : vector<2x1xf32>
    %58 = math.tanh %57 : vector<2x1xf32>
    %c0_31 = arith.constant 0 : index
    %c0_32 = arith.constant 0 : index
    %59 = vector.load %arg11[%c0_31, %c0_32] : memref<2x1xf32, #tpu.memory_space<vmem>>, vector<2x1xf32>
    tpu.vector_store %arg11[%c0_31, %c0_32], %58 {strides = array<i32>} : memref<2x1xf32, #tpu.memory_space<vmem>>, vector<2x1xf32>,
    return
  }
  func.func @transform_0(%arg0: i32) -> (i32, i32, i32) {
    %c0_i32 = arith.constant 0 : i32
    %c0_i32_0 = arith.constant 0 : i32
    %c0_i32_1 = arith.constant 0 : i32
    return %arg0, %c0_i32, %c0_i32_0 : i32, i32, i32
  }
  func.func @transform_1(%arg0: i32) -> (i32, i32) {
    %c0_i32 = arith.constant 0 : i32
    %c0_i32_0 = arith.constant 0 : i32
    %c0_i32_1 = arith.constant 0 : i32
    return %c0_i32, %c0_i32_0 : i32, i32
  }
  func.func @transform_2(%arg0: i32) -> (i32, i32) {
    %c0_i32 = arith.constant 0 : i32
    %c0_i32_0 = arith.constant 0 : i32
    %c0_i32_1 = arith.constant 0 : i32
    return %c0_i32, %c0_i32_0 : i32, i32
  }
  func.func @transform_3(%arg0: i32) -> (i32, i32) {
    %c0_i32 = arith.constant 0 : i32
    %c0_i32_0 = arith.constant 0 : i32
    %c0_i32_1 = arith.constant 0 : i32
    return %c0_i32, %c0_i32_0 : i32, i32
  }
  func.func @transform_4(%arg0: i32) -> (i32, i32) {
    %c0_i32 = arith.constant 0 : i32
    %c0_i32_0 = arith.constant 0 : i32
    %c0_i32_1 = arith.constant 0 : i32
    return %c0_i32, %c0_i32_0 : i32, i32
  }
  func.func @transform_5(%arg0: i32) -> (i32, i32) {
    %c0_i32 = arith.constant 0 : i32
    %c0_i32_0 = arith.constant 0 : i32
    %c0_i32_1 = arith.constant 0 : i32
    return %c0_i32, %c0_i32_0 : i32, i32
  }
  func.func @transform_6(%arg0: i32) -> (i32, i32) {
    %c0_i32 = arith.constant 0 : i32
    %c0_i32_0 = arith.constant 0 : i32
    %c0_i32_1 = arith.constant 0 : i32
    return %c0_i32, %c0_i32_0 : i32, i32
  }
  func.func @transform_7(%arg0: i32) -> (i32, i32) {
    %c0_i32 = arith.constant 0 : i32
    %c0_i32_0 = arith.constant 0 : i32
    %c0_i32_1 = arith.constant 0 : i32
    return %c0_i32, %c0_i32_0 : i32, i32
  }
  func.func @transform_8(%arg0: i32) -> (i32, i32) {
    %c0_i32 = arith.constant 0 : i32
    %c0_i32_0 = arith.constant 0 : i32
    %c0_i32_1 = arith.constant 0 : i32
    return %c0_i32, %c0_i32_0 : i32, i32
  }
  func.func @transform_9(%arg0: i32) -> (i32, i32, i32) {
    %c0_i32 = arith.constant 0 : i32
    %c0_i32_0 = arith.constant 0 : i32
    %c0_i32_1 = arith.constant 0 : i32
    return %arg0, %c0_i32, %c0_i32_0 : i32, i32, i32
  }
  func.func @transform_10(%arg0: i32) -> (i32, i32) {
    %c0_i32 = arith.constant 0 : i32
    %c0_i32_0 = arith.constant 0 : i32
    return %arg0, %c0_i32 : i32, i32
  }
}

</mosaic_0001>

<bundles_post_ra>
// kernel: tpu_custom_call.1
= control target key start
LH: loop header
LB: loop body
LE: loop exit
PB: predicated region body
PF: predicated region fallthrough
CT: control target
= control target key end

     0   :  { %s2733_s0 = inlined_call_operand.hbm [shape: bf16[2,64,256], index: 0, kind: input, shape index: {}]   ;;  %s2734_s1 = inlined_call_operand.hbm [shape: bf16[256,384], index: 1, kind: input, shape index: {}]   ;;  %s2735_s2 = inlined_call_operand.vmem [shape: f32[1,384], index: 2, kind: input, shape index: {}]   ;;  %s2736_s3 = inlined_call_operand.vmem [shape: f32[1,384], index: 3, kind: input, shape index: {}]   ;;  %s2737_s4 = inlined_call_operand.hbm [shape: bf16[256,128], index: 4, kind: input, shape index: {}]   ;;  %s2738_s5 = inlined_call_operand.hbm [shape: f32[64,256], index: 5, kind: input, shape index: {}]   ;;  %s2739_s6 = inlined_call_operand.vmem [shape: f32[1,256], index: 6, kind: input, shape index: {}]   ;;  %s2740_s7 = inlined_call_operand.vmem [shape: f32[1,256], index: 7, kind: input, shape index: {}]   ;;  %s2741_s8 = inlined_call_operand.<no memory space> [shape: f32[1,1], index: 8, kind: input, shape index: {}]   ;;  %s2742_s9 = inlined_call_operand.hbm [shape: f32[2,64,128], index: 9, kind: output, shape index: {0}]   ;;  %s2743_s10 = inlined_call_operand.vmem [shape: f32[2,1], index: 10, kind: output, shape index: {1}]  }
   0x1   :  { %v16_v0 = vstv %s2741_s8 }
   0x2   :  { %17 = vst [vmem:[#allocation2] sm:$0x1] %v16_v0 }
   0x3   :  { %18 = vsyncpa [#allocation4], 0 }
   0x4   :  { %19 = vsyncpa [#allocation7], 0 }
   0x5   :  { %20 = vsyncpa [#allocation10], 0 }
   0x6   :  { %21 = vsyncpa [#allocation5], 0  ;;  %s2125_s15 = smov [#allocation6]   ;;  %s2007_s19 = scalar_lea.hbm %s2734_s1, 6144 }
   0x7   :  { %s39_s16 = sshll.u32 %s2125_s15, 4  ;;  %p2008_p0 = scmp.ne.s32.totalorder %s2734_s1, %s2007_s19  ;;  %s40_s16 = int_to_ptr.vmem [resolvable:$true] %s39_s16 }
   0x8   :  { %p2011_p1 = scmp.lt.u32.totalorder %s2007_s19, %s2734_s1 }
   0xa   :  { %p2013_p2 = pnand %p2011_p1, %p2008_p0 }
   0xc   :  { %2016 = shalt.err (!%p2013_p2)
}
   0xd   :  { %s2017_s8 = scalar_lea.vmem %s40_s16, 6144  ;;  %p2022_p4 = scmp.lt.s32.totalorder %s40_s16, %s40_s16 }
   0xe   :  { %p2018_p3 = scmp.ne.s32.totalorder %s40_s16, %s2017_s8  ;;  %p2023_p5 = scmp.lt.s32.totalorder %s2017_s8, %s2017_s8 }
  0x10   :  { %p2024_p6 = por %p2023_p5, %p2022_p4 }
  0x12   :  { %p2025_p7 = pnand %p2024_p6, %p2018_p3 }
  0x14   :  { %2028 = shalt.err (!%p2025_p7)
}
  0x15   :  { %s2126_s24 = smov 192   ;;  %s2127_s25 = smov 12  }
  0x16   :  { %45 = dma.hbm_to_vmem [thread:$0]  %s2734_s1, 6144, %s40_s16, [#allocation7], %s2126_s24, %s2126_s24, %s2127_s25  }
  0x17   :  { %s2128_s28 = smov [#allocation3]   ;;  %s2029_s12 = scalar_lea.hbm %s2733_s0, 2048 }
  0x18   :  { %s27_s29 = sshll.u32 %s2128_s28, 4  ;;  %p2030_p8 = scmp.ne.s32.totalorder %s2733_s0, %s2029_s12  ;;  %s28_s29 = int_to_ptr.vmem [resolvable:$true] %s27_s29 }
  0x19   :  { %p2033_p9 = scmp.lt.u32.totalorder %s2029_s12, %s2733_s0 }
  0x1b   :  { %p2035_p10 = pnand %p2033_p9, %p2030_p8 }
  0x1d   :  { %2038 = shalt.err (!%p2035_p10)
}
  0x1e   :  { %s2039_s18 = scalar_lea.vmem %s28_s29, 2048  ;;  %p2044_p12 = scmp.lt.s32.totalorder %s28_s29, %s28_s29 }
  0x1f   :  { %p2040_p11 = scmp.ne.s32.totalorder %s28_s29, %s2039_s18  ;;  %p2045_p13 = scmp.lt.s32.totalorder %s2039_s18, %s2039_s18 }
  0x21   :  { %p2046_p0 = por %p2045_p13, %p2044_p12 }
  0x23   :  { %p2047_p1 = pnand %p2046_p0, %p2040_p11 }
  0x25   :  { %2050 = shalt.err (!%p2047_p1)
}
  0x26   :  { %s2129_s1 = smov 128   ;;  %s2130_s16 = smov 8  }
  0x27   :  { %33 = dma.hbm_to_vmem [thread:$0]  %s2733_s0, 2048, %s28_s29, [#allocation4], %s2129_s1, %s2129_s1, %s2130_s16  }
  0x28   :  { %s2131_s21 = smov [#allocation8]   ;;  %s2051_s24 = scalar_lea.hbm %s2737_s4, 2048 }
  0x29   :  { %s55_s22 = sshll.u32 %s2131_s21, 4  ;;  %p2052_p2 = scmp.ne.s32.totalorder %s2737_s4, %s2051_s24  ;;  %s56_s22 = int_to_ptr.vmem [resolvable:$true] %s55_s22 }
  0x2a   :  { %p2055_p3 = scmp.lt.u32.totalorder %s2051_s24, %s2737_s4 }
  0x2c   :  { %p2057_p4 = pnand %p2055_p3, %p2052_p2 }
  0x2e   :  { %2060 = shalt.err (!%p2057_p4)
}
  0x2f   :  { %s2061_s30 = scalar_lea.vmem %s56_s22, 2048  ;;  %p2066_p6 = scmp.lt.s32.totalorder %s56_s22, %s56_s22 }
  0x30   :  { %p2062_p5 = scmp.ne.s32.totalorder %s56_s22, %s2061_s30  ;;  %p2067_p7 = scmp.lt.s32.totalorder %s2061_s30, %s2061_s30 }
  0x32   :  { %p2068_p8 = por %p2067_p7, %p2066_p6 }
  0x34   :  { %p2069_p9 = pnand %p2068_p8, %p2062_p5 }
  0x36   :  { %2072 = shalt.err (!%p2069_p9)
}
  0x37   :  { %s2132_s0 = smov 64   ;;  %s2133_s29 = smov 4  }
  0x38   :  { %61 = dma.hbm_to_vmem [thread:$0]  %s2737_s4, 2048, %s56_s22, [#allocation7], %s2132_s0, %s2132_s0, %s2133_s29  }
  0x39   :  { %s2134_s13 = smov [#allocation9]   ;;  %s2073_s18 = scalar_lea.hbm %s2738_s5, 2048 }
  0x3a   :  { %s67_s14 = sshll.u32 %s2134_s13, 4  ;;  %p2074_p10 = scmp.ne.s32.totalorder %s2738_s5, %s2073_s18  ;;  %s68_s14 = int_to_ptr.vmem [resolvable:$true] %s67_s14 }
  0x3b   :  { %p2077_p11 = scmp.lt.u32.totalorder %s2073_s18, %s2738_s5 }
  0x3d   :  { %p2079_p12 = pnand %p2077_p11, %p2074_p10 }
  0x3f   :  { %2082 = shalt.err (!%p2079_p12)
}
  0x40   :  { %s2083_s8 = scalar_lea.vmem %s68_s14, 2048  ;;  %p2088_p0 = scmp.lt.s32.totalorder %s68_s14, %s68_s14 }
  0x41   :  { %p2084_p13 = scmp.ne.s32.totalorder %s68_s14, %s2083_s8  ;;  %p2089_p1 = scmp.lt.s32.totalorder %s2083_s8, %s2083_s8 }
  0x43   :  { %p2090_p2 = por %p2089_p1, %p2088_p0 }
  0x45   :  { %p2091_p3 = pnand %p2090_p2, %p2084_p13 }
  0x47   :  { %2094 = shalt.err (!%p2091_p3)
}
  0x48   :  { %s2135_s4 = smov 256   ;;  %s2136_s22 = smov 16  }
  0x49   :  { %73 = dma.hbm_to_vmem [thread:$0]  %s2738_s5, 2048, %s68_s14, [#allocation10], %s2135_s4, %s2135_s4, %s2136_s22  }
  0x4a   :  { %2117 = dma.done.wait [#allocation4], 2048  }
  0x4b   :  { %2118 = vsyncadd [#allocation4], 4294965248 }
  0x4c   :  { %2119 = dma.done.wait [#allocation7], 8192  }
  0x4d   :  { %2120 = vsyncadd [#allocation7], 4294959104 }
  0x4e   :  { %2121 = dma.done.wait [#allocation10], 2048  }
  0x4f   :  { %2122 = vsyncadd [#allocation10], 4294965248  ;;  %v1865_v1 = vld [vmem:[#allocation6 + $0x4] ss:$12 sps:$4 sm:$0xff]   ;;  %v1867_v2 = vld [vmem:[#allocation6] ss:$12 sps:$4 sm:$0xff]  }
  0x50   :  { %509 = vmatprep.subr.bf16.mxu0 %v1865_v1  ;;  %v1868_v3 = vld [vmem:[#allocation6 + $0x1c] ss:$12 sps:$4 sm:$0xff]   ;;  %v1870_v4 = vld [vmem:[#allocation6 + $0x18] ss:$12 sps:$4 sm:$0xff]   ;;  %v1871_v5 = vld [vmem:[#allocation6 + $0x34] ss:$12 sps:$4 sm:$0xff]  }
  0x51   :  { %510 = vmatpush1.bf16.msra.mxu0 %v1867_v2  ;;  %v1873_v6 = vld [vmem:[#allocation6 + $0x30] ss:$12 sps:$4 sm:$0xff]   ;;  %v1874_v7 = vld [vmem:[#allocation6 + $0x4c] ss:$12 sps:$4 sm:$0xff]   ;;  %v1876_v8 = vld [vmem:[#allocation6 + $0x48] ss:$12 sps:$4 sm:$0xff]  }
  0x52   :  { %511 = vmatprep.subr.bf16.mxu0 %v1868_v3  ;;  %v1877_v9 = vld [vmem:[#allocation6 + $0x64] ss:$12 sps:$4 sm:$0xff]   ;;  %v1879_v10 = vld [vmem:[#allocation6 + $0x60] ss:$12 sps:$4 sm:$0xff]   ;;  %v1880_v11 = vld [vmem:[#allocation6 + $0x7c] ss:$12 sps:$4 sm:$0xff]  }
  0x53   :  { %v1882_v12 = vld [vmem:[#allocation6 + $0x78] ss:$12 sps:$4 sm:$0xff]   ;;  %v1883_v13 = vld [vmem:[#allocation6 + $0x94] ss:$12 sps:$4 sm:$0xff]   ;;  %v1885_v15 = vld [vmem:[#allocation6 + $0x90] ss:$12 sps:$4 sm:$0xff]  }
  0x54   :  { %v2248_v14 = vld [vmem:[#allocation3 + $0x4] ss:$8 sps:$4 sm:$0xff]   ;;  %v1888_v18 = vld [vmem:[#allocation6 + $0xa8] ss:$12 sps:$4 sm:$0xff]   ;;  %v1897_v29 = vld [vmem:[#allocation6 + $0xf0] ss:$12 sps:$4 sm:$0xff]  }
  0x55   :  { %512 = vmatpush1.bf16.msra.mxu0 %v1870_v4  ;;  %v1886_v16 = vld [vmem:[#allocation6 + $0xac] ss:$12 sps:$4 sm:$0xff]   ;;  %541 = vmatprep.mubr.bf16.mxu0 %v2248_v14  ;;  %v1889_v19 = vld [vmem:[#allocation6 + $0xc4] ss:$12 sps:$4 sm:$0xff]   ;;  %v1892_v21 = vld [vmem:[#allocation6 + $0xdc] ss:$12 sps:$4 sm:$0xff]  }
  0x56   :  { %513 = vmatprep.subr.bf16.mxu0 %v1871_v5  ;;  %v2251_v17 = vld [vmem:[#allocation3 + $0x24] ss:$8 sps:$4 sm:$0xff]   ;;  %v2254_v22 = vld [vmem:[#allocation6 + $0xc8] ss:$12 sps:$4 sm:$0xff]   ;;  %v2271_v32 = vld [vmem:[#allocation6 + $0x110] ss:$12 sps:$4 sm:$0xff]  }
  0x57   :  { %670 = vmatprep.mubr.bf16.mxu1 %v2251_v17  ;;  %v1891_v20 = vld [vmem:[#allocation6 + $0xc0] ss:$12 sps:$4 sm:$0xff]   ;;  %v1894_v23 = vld [vmem:[#allocation6 + $0xd8] ss:$12 sps:$4 sm:$0xff]   ;;  %v2256_v24 = vld [vmem:[#allocation6 + $0x8] ss:$12 sps:$4 sm:$0xff]   ;;  %1833 = vmatprep.subr.bf16.mxu1 %v2254_v22 }
  0x58   :  { %v1895_v25 = vld [vmem:[#allocation6 + $0xf4] ss:$12 sps:$4 sm:$0xff]   ;;  %1841 = vmatpush3.bf16.msra.mxu1 %v2256_v24  ;;  %v2265_v28 = vld [vmem:[#allocation6 + $0xf8] ss:$12 sps:$4 sm:$0xff]   ;;  %v2274_v35 = vld [vmem:[#allocation6 + $0x50] ss:$12 sps:$4 sm:$0xff]  }
  0x59   :  { %514 = vmatpush1.bf16.msra.mxu0 %v1873_v6  ;;  %v2259_v26 = vld [vmem:[#allocation6 + $0xe0] ss:$12 sps:$4 sm:$0xff]   ;;  %v2268_v31 = vld [vmem:[#allocation6 + $0x38] ss:$12 sps:$4 sm:$0xff]   ;;  %v1900_v33 = vld [vmem:[#allocation6 + $0x108] ss:$12 sps:$4 sm:$0xff]  }
  0x5a   :  { %515 = vmatprep.subr.bf16.mxu0 %v1874_v7  ;;  %v2262_v27 = vld [vmem:[#allocation6 + $0x20] ss:$12 sps:$4 sm:$0xff]   ;;  %1834 = vmatprep.subr.bf16.mxu1 %v2259_v26  ;;  %v1901_v34 = vld [vmem:[#allocation6 + $0x124] ss:$12 sps:$4 sm:$0xff]   ;;  %v2277_v36 = vld [vmem:[#allocation6 + $0x128] ss:$12 sps:$4 sm:$0xff]  }
  0x5b   :  { %v1898_v30 = vld [vmem:[#allocation6 + $0x10c] ss:$12 sps:$4 sm:$0xff]   ;;  %v1904_v38 = vld [vmem:[#allocation6 + $0x13c] ss:$12 sps:$4 sm:$0xff]   ;;  %v1907_v42 = vld [vmem:[#allocation6 + $0x154] ss:$12 sps:$4 sm:$0xff]  }
  0x5c   :  { %1842 = vmatpush3.bf16.msra.mxu1 %v2262_v27  ;;  %v1903_v37 = vld [vmem:[#allocation6 + $0x120] ss:$12 sps:$4 sm:$0xff]   ;;  %v2280_v39 = vld [vmem:[#allocation6 + $0x68] ss:$12 sps:$4 sm:$0xff]   ;;  %v1906_v41 = vld [vmem:[#allocation6 + $0x138] ss:$12 sps:$4 sm:$0xff]  }
  0x5d   :  { %516 = vmatpush1.bf16.msra.mxu0 %v1876_v8  ;;  %1835 = vmatprep.subr.bf16.mxu1 %v2265_v28  ;;  %v2283_v40 = vld [vmem:[#allocation6 + $0x140] ss:$12 sps:$4 sm:$0xff]   ;;  %v2289_v44 = vld [vmem:[#allocation6 + $0x158] ss:$12 sps:$4 sm:$0xff]   ;;  %v1909_v45 = vld [vmem:[#allocation6 + $0x150] ss:$12 sps:$4 sm:$0xff]  }
  0x5e   :  { %517 = vmatprep.subr.bf16.mxu0 %v1877_v9  ;;  %v2286_v43 = vld [vmem:[#allocation6 + $0x80] ss:$12 sps:$4 sm:$0xff]   ;;  %v2292_v47 = vld [vmem:[#allocation6 + $0x98] ss:$12 sps:$4 sm:$0xff]   ;;  %v2295_v48 = vld [vmem:[#allocation6 + $0x170] ss:$12 sps:$4 sm:$0xff]  }
  0x5f   :  { %v1910_v46 = vld [vmem:[#allocation6 + $0x16c] ss:$12 sps:$4 sm:$0xff]   ;;  %v1912_v49 = vld [vmem:[#allocation6 + $0x168] ss:$12 sps:$4 sm:$0xff]   ;;  %v2297_v50 = vld [vmem:[#allocation6 + $0xb0] ss:$12 sps:$4 sm:$0xff]  }
  0x60   :  { %1843 = vmatpush3.bf16.msra.mxu1 %v2268_v31  ;;  %v1953_v51 = vld [vmem:[#allocation8 + $0x40] sm:$0xff]   ;;  %v2303_v53 = vld [vmem:[#allocation3 + $0x14] ss:$8 sps:$4 sm:$0xff]   ;;  %v1955_v57 = vld [vmem:[#allocation8 + $0x48] sm:$0xff]   ;;  %vm1578_vm1 = vcmask 1041409   ;;  %vm1584_vm2 = vcmask 1041408  }
  0x61   :  { %518 = vmatpush1.bf16.msra.mxu0 %v1879_v10  ;;  %1836 = vmatprep.subr.bf16.mxu1 %v2271_v32  ;;  %v2301_v52 = vld [vmem:[#allocation3] ss:$8 sps:$4 sm:$0xff]   ;;  %v1922_v56 = vld [vmem:[#allocation3 + $0x34] ss:$8 sps:$4 sm:$0xff]   ;;  %v2311_v59 = vld [vmem:[#allocation3 + $0x10] ss:$8 sps:$4 sm:$0xff]  }
  0x62   :  { %519 = vmatprep.subr.bf16.mxu0 %v1880_v11  ;;  %v1921_v54 = vld [vmem:[#allocation3 + $0x20] ss:$8 sps:$4 sm:$0xff]   ;;  %v1924_v60 = vld [vmem:[#allocation3 + $0x30] ss:$8 sps:$4 sm:$0xff]   ;;  %v1925_v62 = vld [vmem:[#allocation3 + $0x44] ss:$8 sps:$4 sm:$0xff]  }
  0x63   :  { %v1954_v55 = vld [vmem:[#allocation8] sm:$0xff]   ;;  %v1956_v58 = vld [vmem:[#allocation8 + $0x8] sm:$0xff]   ;;  %v1957_v61 = vld [vmem:[#allocation8 + $0x50] sm:$0xff]   ;;  %vm1599_vm3 = vcmask 1024  }
  0x64   :  { %1844 = vmatpush3.bf16.msra.mxu1 %v2274_v35  ;;  %v1958_v63 = vld [vmem:[#allocation8 + $0x10] sm:$0xff]   ;;  %v1959_v0 = vld [vmem:[#allocation8 + $0x58] sm:$0xff]   ;;  %v1927_v1 = vld [vmem:[#allocation3 + $0x40] ss:$8 sps:$4 sm:$0xff]  }
  0x65   :  { %520 = vmatpush1.bf16.msra.mxu0 %v1882_v12  ;;  %1837 = vmatprep.subr.bf16.mxu1 %v2277_v36  ;;  %v1960_v2 = vld [vmem:[#allocation8 + $0x18] sm:$0xff]   ;;  %v1961_v4 = vld [vmem:[#allocation8 + $0x60] sm:$0xff]   ;;  %v1963_v7 = vld [vmem:[#allocation8 + $0x68] sm:$0xff]  }
  0x66   :  { %521 = vmatprep.subr.bf16.mxu0 %v1883_v13  ;;  %v1928_v3 = vld [vmem:[#allocation3 + $0x54] ss:$8 sps:$4 sm:$0xff]   ;;  %v1962_v5 = vld [vmem:[#allocation8 + $0x20] sm:$0xff]   ;;  %v1930_v6 = vld [vmem:[#allocation3 + $0x50] ss:$8 sps:$4 sm:$0xff]  }
  0x67   :  { %v1931_v8 = vld [vmem:[#allocation3 + $0x64] ss:$8 sps:$4 sm:$0xff]   ;;  %v1933_v10 = vld [vmem:[#allocation3 + $0x60] ss:$8 sps:$4 sm:$0xff]   ;;  %v1934_v11 = vld [vmem:[#allocation3 + $0x74] ss:$8 sps:$4 sm:$0xff]  }
  0x68   :  { %1845 = vmatpush3.bf16.msra.mxu1 %v2280_v39  ;;  %v1964_v9 = vld [vmem:[#allocation8 + $0x28] sm:$0xff]   ;;  %v1936_v12 = vld [vmem:[#allocation3 + $0x70] ss:$8 sps:$4 sm:$0xff]  }
  0x69   :  { %522 = vmatpush1.bf16.msra.mxu0 %v1885_v15  ;;  %1838 = vmatprep.subr.bf16.mxu1 %v2283_v40  ;;  %v1965_v13 = vld [vmem:[#allocation8 + $0x70] sm:$0xff]  }
  0x6a   :  { %523 = vmatprep.subr.bf16.mxu0 %v1886_v16  ;;  %v1966_v15 = vld [vmem:[#allocation8 + $0x30] sm:$0xff]   ;;  %v1967_v16 = vld [vmem:[#allocation8 + $0x78] sm:$0xff]  }
  0x6c   :  { %1846 = vmatpush3.bf16.msra.mxu1 %v2286_v43 }
  0x6d   :  { %524 = vmatpush1.bf16.msra.mxu0 %v1888_v18  ;;  %1839 = vmatprep.subr.bf16.mxu1 %v2289_v44  ;;  %v2137_v18 = vmov 0  }
  0x6e   :  { %525 = vmatprep.subr.bf16.mxu0 %v1889_v19  ;;  %1864 = vset.pattern.permute.xlu1 %v2137_v18  ;;  %v721_v19 = vlaneseq }
  0x6f   :  { %1863 = vset.pattern.permute.xlu0 %v2137_v18 }
  0x70   :  { %1847 = vmatpush3.bf16.msra.mxu1 %v2292_v47 }
  0x71   :  { %526 = vmatpush1.bf16.msra.mxu0 %v1891_v20  ;;  %1840 = vmatprep.subr.bf16.mxu1 %v2295_v48 }
  0x72   :  { %527 = vmatprep.subr.bf16.mxu0 %v1892_v21  ;;  %v2341_v21 = vld [vmem:[%s2735_s2] sm:$0x7] }
  0x74   :  { %1848 = vmatpush3.bf16.msra.mxu1 %v2297_v50 }
  0x75   :  { %528 = vmatpush1.bf16.msra.mxu0 %v1894_v23  ;;  %1769 = vmatprep.subr.bf16.mxu1 %v1953_v51  ;;  %v2349_v23 = vld [vmem:[%s2736_s3] sm:$0x7] }
  0x76   :  { %529 = vmatprep.subr.bf16.mxu0 %v1895_v25 }
  0x77   :  { %671 = vmatmul.mubr.bf16.vlgmr.msra.gmra.mrb[0].mxu1 %v1921_v54 }
  0x78   :  { %678 = vmatprep.mubr.bf16.mxu1 %v1922_v56  ;;  %1770 = vmatpush3.bf16.msra.mxu1 %v1954_v55 }
  0x79   :  { %530 = vmatpush1.bf16.msra.mxu0 %v1897_v29  ;;  %1771 = vmatprep.subr.bf16.mxu1 %v1955_v57 }
  0x7a   :  { %531 = vmatprep.subr.bf16.mxu0 %v1898_v30 }
  0x7c   :  { %1772 = vmatpush3.bf16.msra.mxu1 %v1956_v58 }
  0x7d   :  { %532 = vmatpush1.bf16.msra.mxu0 %v1900_v33  ;;  %1773 = vmatprep.subr.bf16.mxu1 %v1957_v61 }
  0x7e   :  { %533 = vmatprep.subr.bf16.mxu0 %v1901_v34 }
  0x7f   :  { %679 = vmatmul.mubr.bf16.gmra.mrb[4].mxu1 %v1924_v60 }
  0x80   :  { %686 = vmatprep.mubr.bf16.mxu1 %v1925_v62  ;;  %1774 = vmatpush3.bf16.msra.mxu1 %v1958_v63 }
  0x81   :  { %534 = vmatpush1.bf16.msra.mxu0 %v1903_v37  ;;  %1775 = vmatprep.subr.bf16.mxu1 %v1959_v0 }
  0x82   :  { %535 = vmatprep.subr.bf16.mxu0 %v1904_v38 }
  0x84   :  { %1776 = vmatpush3.bf16.msra.mxu1 %v1960_v2 }
  0x85   :  { %536 = vmatpush1.bf16.msra.mxu0 %v1906_v41  ;;  %1777 = vmatprep.subr.bf16.mxu1 %v1961_v4 }
  0x86   :  { %537 = vmatprep.subr.bf16.mxu0 %v1907_v42 }
  0x87   :  { %687 = vmatmul.mubr.bf16.gmra.mrb[8].mxu1 %v1927_v1 }
  0x88   :  { %694 = vmatprep.mubr.bf16.mxu1 %v1928_v3  ;;  %1778 = vmatpush3.bf16.msra.mxu1 %v1962_v5 }
  0x89   :  { %538 = vmatpush1.bf16.msra.mxu0 %v1909_v45  ;;  %1779 = vmatprep.subr.bf16.mxu1 %v1963_v7 }
  0x8a   :  { %539 = vmatprep.subr.bf16.mxu0 %v1910_v46 }
  0x8c   :  { %1780 = vmatpush3.bf16.msra.mxu1 %v1964_v9 }
  0x8d   :  { %540 = vmatpush1.bf16.msra.mxu0 %v1912_v49  ;;  %1781 = vmatprep.subr.bf16.mxu1 %v1965_v13 }
  0x8e   :  { %1705 = vmatprep.subr.bf16.mxu0 %v2254_v22 }
  0x8f   :  { %695 = vmatmul.mubr.bf16.gmra.mrb[12].mxu1 %v1930_v6 }
  0x90   :  { %542 = vmatmul.mubr.bf16.vlgmr.msra.gmra.mrb[0].mxu0 %v2301_v52  ;;  %702 = vmatprep.mubr.bf16.mxu1 %v1931_v8 }
  0x91   :  { %551 = vmatprep.mubr.bf16.mxu0 %v2303_v53  ;;  %1706 = vmatpush3.bf16.msra.mxu0 %v2256_v24 }
  0x92   :  { %1707 = vmatprep.subr.bf16.mxu0 %v2259_v26  ;;  %1782 = vmatpush3.bf16.msra.mxu1 %v1966_v15 }
  0x93   :  { %1783 = vmatprep.subr.bf16.mxu1 %v1967_v16 }
  0x95   :  { %1708 = vmatpush3.bf16.msra.mxu0 %v2262_v27 }
  0x96   :  { %1709 = vmatprep.subr.bf16.mxu0 %v2265_v28 }
  0x97   :  { %703 = vmatmul.mubr.bf16.gmra.mrb[16].mxu1 %v1933_v10 }
  0x98   :  { %552 = vmatmul.mubr.bf16.gmra.mrb[4].mxu0 %v2311_v59  ;;  %710 = vmatprep.mubr.bf16.mxu1 %v1934_v11 }
  0x99   :  { %561 = vmatprep.mubr.bf16.mxu0 %v2251_v17  ;;  %1710 = vmatpush3.bf16.msra.mxu0 %v2268_v31  ;;  %v1968_v17 = vld [vmem:[#allocation8 + $0x38] sm:$0xff]  }
  0x9a   :  { %1711 = vmatprep.subr.bf16.mxu0 %v2271_v32  ;;  %1784 = vmatpush3.bf16.msra.mxu1 %v1968_v17 }
  0x9d   :  { %1712 = vmatpush3.bf16.msra.mxu0 %v2274_v35 }
  0x9e   :  { %1713 = vmatprep.subr.bf16.mxu0 %v2277_v36 }
  0x9f   :  { %711 = vmatmul.mubr.bf16.gmra.mrb[20].mxu1 %v1936_v12 }
  0xa0   :  { %562 = vmatmul.mubr.bf16.gmra.mrb[8].mxu0 %v1921_v54 }
  0xa1   :  { %571 = vmatprep.mubr.bf16.mxu0 %v1922_v56  ;;  %1714 = vmatpush3.bf16.msra.mxu0 %v2280_v39 }
  0xa2   :  { %1715 = vmatprep.subr.bf16.mxu0 %v2283_v40 }
  0xa5   :  { %1716 = vmatpush3.bf16.msra.mxu0 %v2286_v43 }
  0xa6   :  { %1717 = vmatprep.subr.bf16.mxu0 %v2289_v44 }
  0xa8   :  { %572 = vmatmul.mubr.bf16.gmra.mrb[12].mxu0 %v1924_v60 }
  0xa9   :  { %581 = vmatprep.mubr.bf16.mxu0 %v1925_v62  ;;  %1718 = vmatpush3.bf16.msra.mxu0 %v2292_v47 }
  0xaa   :  { %1719 = vmatprep.subr.bf16.mxu0 %v2295_v48 }
  0xad   :  { %1720 = vmatpush3.bf16.msra.mxu0 %v2297_v50 }
  0xb0   :  { %582 = vmatmul.mubr.bf16.gmra.mrb[16].mxu0 %v1927_v1 }
  0xb1   :  { %591 = vmatprep.mubr.bf16.mxu0 %v1928_v3 }
  0xb8   :  { %592 = vmatmul.mubr.bf16.gmra.mrb[20].mxu0 %v1930_v6 }
  0xb9   :  { %601 = vmatprep.mubr.bf16.mxu0 %v1931_v8 }
  0xc0   :  { %602 = vmatmul.mubr.bf16.gmra.mrb[24].mxu0 %v1933_v10 }
  0xc1   :  { %611 = vmatprep.mubr.bf16.mxu0 %v1934_v11 }
  0xc8   :  { %612 = vmatmul.mubr.bf16.gmra.mrb[28].mxu0 %v1936_v12 }
  0xc9   :  { %654 = vmatprep.mubr.bf16.mxu0 %v2248_v14  ;;  %v2333_v14 = vshrl.u32 %v721_v19, 7 }
  0xcb   :  { %v2336_v20 = vsub.s32 0, %v2333_v14  ;;  %v2344_v22 = vsub.s32 1, %v2333_v14  ;;  %v731_v6 = vsub.s32 2, %v2333_v14 }
  0xcd   :  { %v2353_v24 = vrot.slane %v2341_v21, %v2336_v20  ;;  %v2357_v25 = vrot.slane %v2341_v21, %v2344_v22  ;;  %v2361_v26 = vrot.slane %v2349_v23, %v2336_v20  ;;  %v2365_v28 = vrot.slane %v2349_v23, %v2344_v22 }
  0xd0   :  { %655 = vmatmul.mubr.bf16.vlgmr.msra.gmra.mrb[32].mxu0 %v2301_v52 }
  0xd1   :  { %662 = vmatprep.mubr.bf16.mxu0 %v2303_v53 }
  0xd8   :  { %663 = vmatmul.mubr.bf16.gmra.mrb[36].mxu0 %v2311_v59 }
 0x14a   :  { %v1733_v29 = vpop.f32.mrb[0].mxu1 }
 0x14b   :  { %v1734_v32 = vpop.f32.mrb[1].mxu1 }
 0x14c   :  { %v2369_v35 = vadd.f32 %v1734_v32, %v1733_v29  ;;  %v1736_v36 = vpop.f32.mrb[2].mxu1 }
 0x14d   :  { %v1737_v40 = vpop.f32.mrb[3].mxu1 }
 0x14e   :  { %v2375_v43 = vadd.f32 %v1737_v40, %v1736_v36 }
 0x152   :  { %v1739_v51 = vpop.f32.mrb[4].mxu1 }
 0x153   :  { %v1740_v55 = vpop.f32.mrb[5].mxu1 }
 0x154   :  { %v2381_v59 = vadd.f32 %v1740_v55, %v1739_v51  ;;  %v1742_v60 = vpop.f32.mrb[6].mxu1 }
 0x155   :  { %v1743_v0 = vpop.f32.mrb[7].mxu1 }
 0x156   :  { %v2387_v3 = vadd.f32 %v1743_v0, %v1742_v60 }
 0x15a   :  { %v1745_v12 = vpop.f32.mrb[8].mxu1 }
 0x15b   :  { %v1746_v17 = vpop.f32.mrb[9].mxu1 }
 0x15c   :  { %v1748_v14 = vpop.f32.mrb[10].mxu1 }
 0x15d   :  { %v1749_v36 = vpop.f32.mrb[11].mxu1 }
 0x163   :  { %v543_v27 = vpop.f32.mrb[0].mxu0 }
 0x164   :  { %v736_v30 = vmul.f32 %v2353_v24, %v543_v27  ;;  %v545_v31 = vpop.f32.mrb[1].mxu0 }
 0x165   :  { %v737_v33 = vmul.f32 %v2357_v25, %v545_v31  ;;  %v547_v34 = vpop.f32.mrb[2].mxu0  ;;  %v1747_v31 = vadd.f32 %v1746_v17, %v1745_v12 }
 0x166   :  { %v801_v37 = vadd.f32 %v2361_v26, %v736_v30  ;;  %v739_v38 = vmul.f32 %v2353_v24, %v547_v34  ;;  %v549_v39 = vpop.f32.mrb[3].mxu0  ;;  %v2395_v30 = vrot.slane %v2341_v21, %v731_v6  ;;  %v1750_v21 = vadd.f32 %v1749_v36, %v1748_v14 }
 0x167   :  { %v802_v41 = vadd.f32 %v2365_v28, %v737_v33  ;;  %v740_v42 = vmul.f32 %v2357_v25, %v549_v39 }
 0x168   :  { %v804_v44 = vadd.f32 %v2361_v26, %v739_v38  ;;  %v849_v46 = vmax.f32 %v801_v37, 0.0  ;;  %v2400_v37 = vrot.slane %v2349_v23, %v731_v6  ;;  %v762_v40 = vmul.f32 %v1747_v31, %v2395_v30 }
 0x169   :  { %v805_v45 = vadd.f32 %v2365_v28, %v740_v42  ;;  %v850_v48 = vmax.f32 %v802_v41, 0.0 }
 0x16a   :  { %v852_v47 = vmax.f32 %v804_v44, 0.0  ;;  %v765_v44 = vmul.f32 %v1750_v21, %v2395_v30 }
 0x16b   :  { %v853_v49 = vmax.f32 %v805_v45, 0.0  ;;  %v553_v50 = vpop.f32.mrb[4].mxu0  ;;  %v827_v45 = vadd.f32 %v2400_v37, %v762_v40 }
 0x16c   :  { %v897_v52 = vpack.c.bf16 %v852_v47, %v849_v46  ;;  %v742_v53 = vmul.f32 %v2353_v24, %v553_v50  ;;  %v555_v54 = vpop.f32.mrb[5].mxu0  ;;  %v1751_v50 = vpop.f32.mrb[12].mxu1  ;;  %v830_v51 = vadd.f32 %v2400_v37, %v765_v44 }
 0x16d   :  { %v743_v56 = vmul.f32 %v2357_v25, %v555_v54  ;;  %v557_v57 = vpop.f32.mrb[6].mxu0  ;;  %v898_v58 = vpack.c.bf16 %v853_v49, %v850_v48 }
 0x16e   :  { %v807_v61 = vadd.f32 %v2361_v26, %v742_v53  ;;  %v745_v62 = vmul.f32 %v2353_v24, %v557_v57  ;;  %v559_v63 = vpop.f32.mrb[7].mxu0 }
 0x16f   :  { %v808_v1 = vadd.f32 %v2365_v28, %v743_v56  ;;  %v746_v2 = vmul.f32 %v2357_v25, %v559_v63  ;;  %1073 = vmatprep.mubr.bf16.mxu1 %v898_v58  ;;  %v1752_v56 = vpop.f32.mrb[13].mxu1  ;;  %v878_v63 = vmax.f32 %v830_v51, 0.0 }
 0x170   :  { %v810_v4 = vadd.f32 %v2361_v26, %v745_v62  ;;  %1074 = vmatmul.mubr.bf16.vlgmr.msra.gmra.mrb[24].mxu1 %v897_v52  ;;  %v855_v7 = vmax.f32 %v807_v61, 0.0  ;;  %v875_v52 = vmax.f32 %v827_v45, 0.0  ;;  %v1753_v61 = vadd.f32 %v1752_v56, %v1751_v50  ;;  %v1754_v62 = vpop.f32.mrb[14].mxu1 }
 0x171   :  { %v811_v5 = vadd.f32 %v2365_v28, %v746_v2  ;;  %v856_v9 = vmax.f32 %v808_v1, 0.0  ;;  %1420 = vperm.xlu1 %1864, %v878_v63  }
 0x172   :  { %v858_v8 = vmax.f32 %v810_v4, 0.0  ;;  %1415 = vperm.xlu0 %1863, %v875_v52   ;;  %v1755_v4 = vpop.f32.mrb[15].mxu1 }
 0x173   :  { %v859_v10 = vmax.f32 %v811_v5, 0.0  ;;  %v563_v11 = vpop.f32.mrb[8].mxu0 }
 0x174   :  { %v748_v13 = vmul.f32 %v2353_v24, %v563_v11  ;;  %v565_v15 = vpop.f32.mrb[9].mxu0  ;;  %v899_v16 = vpack.c.bf16 %v858_v8, %v855_v7  ;;  %v768_v7 = vmul.f32 %v1753_v61, %v2395_v30  ;;  %v1756_v8 = vadd.f32 %v1755_v4, %v1754_v62 }
 0x175   :  { %v749_v18 = vmul.f32 %v2357_v25, %v565_v15  ;;  %v567_v27 = vpop.f32.mrb[10].mxu0  ;;  %v900_v29 = vpack.c.bf16 %v859_v10, %v856_v9 }
 0x176   :  { %v813_v32 = vadd.f32 %v2361_v26, %v748_v13  ;;  %v751_v33 = vmul.f32 %v2353_v24, %v567_v27  ;;  %v569_v34 = vpop.f32.mrb[11].mxu0  ;;  %v771_v11 = vmul.f32 %v1756_v8, %v2395_v30  ;;  %v833_v12 = vadd.f32 %v2400_v37, %v768_v7  ;;  %v1757_v27 = vpop.f32.mrb[16].mxu1 }
 0x177   :  { %v814_v38 = vadd.f32 %v2365_v28, %v749_v18  ;;  %v752_v39 = vmul.f32 %v2357_v25, %v569_v34  ;;  %1081 = vmatprep.mubr.bf16.mxu1 %v900_v29  ;;  %v1758_v34 = vpop.f32.mrb[17].mxu1 }
 0x178   :  { %v816_v41 = vadd.f32 %v2361_v26, %v751_v33  ;;  %1082 = vmatmul.mubr.bf16.gmra.mrb[28].mxu1 %v899_v16  ;;  %v861_v46 = vmax.f32 %v813_v32, 0.0  ;;  %v881_v29 = vmax.f32 %v833_v12, 0.0  ;;  %v836_v31 = vadd.f32 %v2400_v37, %v771_v11 }
 0x179   :  { %v817_v42 = vadd.f32 %v2365_v28, %v752_v39  ;;  %v862_v47 = vmax.f32 %v814_v38, 0.0  ;;  %v1759_v40 = vadd.f32 %v1758_v34, %v1757_v27 }
 0x17a   :  { %v864_v23 = vmax.f32 %v816_v41, 0.0  ;;  %1425 = vperm.xlu1 %1864, %v881_v29   ;;  %v884_v21 = vmax.f32 %v836_v31, 0.0  ;;  %v1760_v41 = vpop.f32.mrb[18].mxu1 }
 0x17b   :  { %v865_v48 = vmax.f32 %v817_v42, 0.0  ;;  %v573_v49 = vpop.f32.mrb[12].mxu0 }
 0x17c   :  { %v754_v53 = vmul.f32 %v2353_v24, %v573_v49  ;;  %v575_v54 = vpop.f32.mrb[13].mxu0  ;;  %v901_v55 = vpack.c.bf16 %v864_v23, %v861_v46  ;;  %v1761_v46 = vpop.f32.mrb[19].mxu1 }
 0x17d   :  { %v755_v57 = vmul.f32 %v2357_v25, %v575_v54  ;;  %v577_v58 = vpop.f32.mrb[14].mxu0  ;;  %v902_v60 = vpack.c.bf16 %v865_v48, %v862_v47  ;;  %v774_v48 = vmul.f32 %v1759_v40, %v2395_v30  ;;  %v2429_v49 = vadd.f32 %v1761_v46, %v1760_v41 }
 0x17e   :  { %v819_v0 = vadd.f32 %v2361_v26, %v754_v53  ;;  %v757_v1 = vmul.f32 %v2353_v24, %v577_v58  ;;  %v579_v2 = vpop.f32.mrb[15].mxu0  ;;  %1430 = vperm.xlu1 %1864, %v884_v21  }
 0x17f   :  { %v820_v5 = vadd.f32 %v2365_v28, %v755_v57  ;;  %v758_v6 = vmul.f32 %v2357_v25, %v579_v2  ;;  %1089 = vmatprep.mubr.bf16.mxu1 %v902_v60  ;;  %v839_v52 = vadd.f32 %v2400_v37, %v774_v48  ;;  %v1763_v60 = vpop.f32.mrb[20].mxu1 }
 0x180   :  { %v822_v9 = vadd.f32 %v2361_v26, %v757_v1  ;;  %1090 = vmatmul.mubr.bf16.gmra.mrb[32].mxu1 %v901_v55  ;;  %v867_v13 = vmax.f32 %v819_v0, 0.0  ;;  %v1764_v0 = vpop.f32.mrb[21].mxu1 }
 0x181   :  { %v823_v10 = vadd.f32 %v2365_v28, %v758_v6  ;;  %v868_v16 = vmax.f32 %v820_v5, 0.0  ;;  %v887_v58 = vmax.f32 %v839_v52, 0.0  ;;  %v2436_v5 = vadd.f32 %v1764_v0, %v1763_v60  ;;  %v1766_v6 = vpop.f32.mrb[22].mxu1 }
 0x182   :  { %v870_v15 = vmax.f32 %v822_v9, 0.0 }
 0x183   :  { %v871_v17 = vmax.f32 %v823_v10, 0.0  ;;  %v583_v18 = vpop.f32.mrb[16].mxu0  ;;  %1435 = vperm.xlu1 %1864, %v887_v58   ;;  %v1767_v10 = vpop.f32.mrb[23].mxu1 }
 0x184   :  { %v760_v14 = vmul.f32 %v2353_v24, %v583_v18  ;;  %v585_v32 = vpop.f32.mrb[17].mxu0  ;;  %v903_v33 = vpack.c.bf16 %v870_v15, %v867_v13  ;;  %v2442_v13 = vadd.f32 %v1767_v10, %v1766_v6 }
 0x185   :  { %v761_v36 = vmul.f32 %v2357_v25, %v585_v32  ;;  %v587_v38 = vpop.f32.mrb[18].mxu0  ;;  %v904_v39 = vpack.c.bf16 %v871_v17, %v868_v16 }
 0x186   :  { %v825_v42 = vadd.f32 %v2361_v26, %v760_v14  ;;  %v763_v44 = vmul.f32 %v2353_v24, %v587_v38  ;;  %v589_v45 = vpop.f32.mrb[19].mxu0 }
 0x187   :  { %v826_v23 = vadd.f32 %v2365_v28, %v761_v36  ;;  %v764_v47 = vmul.f32 %v2357_v25, %v589_v45  ;;  %1097 = vmatprep.mubr.bf16.mxu1 %v904_v39 }
 0x188   :  { %v828_v50 = vadd.f32 %v2361_v26, %v763_v44  ;;  %1098 = vmatmul.mubr.bf16.gmra.mrb[36].mxu1 %v903_v33  ;;  %v873_v53 = vmax.f32 %v825_v42, 0.0 }
 0x189   :  { %v829_v51 = vadd.f32 %v2365_v28, %v764_v47  ;;  %v874_v55 = vmax.f32 %v826_v23, 0.0 }
 0x18a   :  { %v876_v54 = vmax.f32 %v828_v50, 0.0 }
 0x18b   :  { %v877_v56 = vmax.f32 %v829_v51, 0.0  ;;  %v593_v57 = vpop.f32.mrb[20].mxu0 }
 0x18c   :  { %v766_v61 = vmul.f32 %v2353_v24, %v593_v57  ;;  %v595_v62 = vpop.f32.mrb[21].mxu0  ;;  %v905_v63 = vpack.c.bf16 %v876_v54, %v873_v53 }
 0x18d   :  { %v767_v1 = vmul.f32 %v2357_v25, %v595_v62  ;;  %v597_v2 = vpop.f32.mrb[22].mxu0  ;;  %v906_v4 = vpack.c.bf16 %v877_v56, %v874_v55 }
 0x18e   :  { %v831_v7 = vadd.f32 %v2361_v26, %v766_v61  ;;  %v769_v8 = vmul.f32 %v2353_v24, %v597_v2  ;;  %v599_v9 = vpop.f32.mrb[23].mxu0 }
 0x18f   :  { %v832_v11 = vadd.f32 %v2365_v28, %v767_v1  ;;  %v770_v12 = vmul.f32 %v2357_v25, %v599_v9  ;;  %1105 = vmatprep.mubr.bf16.mxu1 %v906_v4 }
 0x190   :  { %v834_v15 = vadd.f32 %v2361_v26, %v769_v8  ;;  %1106 = vmatmul.mubr.bf16.gmra.mrb[40].mxu1 %v905_v63  ;;  %v879_v17 = vmax.f32 %v831_v7, 0.0 }
 0x191   :  { %v835_v16 = vadd.f32 %v2365_v28, %v770_v12  ;;  %v880_v27 = vmax.f32 %v832_v11, 0.0 }
 0x192   :  { %v882_v18 = vmax.f32 %v834_v15, 0.0 }
 0x193   :  { %v883_v29 = vmax.f32 %v835_v16, 0.0  ;;  %v603_v31 = vpop.f32.mrb[24].mxu0 }
 0x194   :  { %v772_v14 = vmul.f32 %v2353_v24, %v603_v31  ;;  %v605_v32 = vpop.f32.mrb[25].mxu0  ;;  %v907_v33 = vpack.c.bf16 %v882_v18, %v879_v17 }
 0x195   :  { %v773_v34 = vmul.f32 %v2357_v25, %v605_v32  ;;  %v607_v36 = vpop.f32.mrb[26].mxu0  ;;  %v908_v38 = vpack.c.bf16 %v883_v29, %v880_v27 }
 0x196   :  { %v837_v39 = vadd.f32 %v2361_v26, %v772_v14  ;;  %v775_v40 = vmul.f32 %v2353_v24, %v607_v36  ;;  %v609_v21 = vpop.f32.mrb[27].mxu0 }
 0x197   :  { %v838_v41 = vadd.f32 %v2365_v28, %v773_v34  ;;  %v776_v42 = vmul.f32 %v2357_v25, %v609_v21  ;;  %1113 = vmatprep.mubr.bf16.mxu1 %v908_v38 }
 0x198   :  { %v840_v44 = vadd.f32 %v2361_v26, %v775_v40  ;;  %1114 = vmatmul.mubr.bf16.gmra.mrb[44].mxu1 %v907_v33  ;;  %v885_v46 = vmax.f32 %v837_v39, 0.0 }
 0x199   :  { %v841_v45 = vadd.f32 %v2365_v28, %v776_v42  ;;  %v886_v47 = vmax.f32 %v838_v41, 0.0 }
 0x19a   :  { %v888_v23 = vmax.f32 %v840_v44, 0.0  ;;  %v1359_v44 = vld [vmem:[#allocation9 + $0x10] sm:$0xff] }
 0x19b   :  { %v889_v48 = vmax.f32 %v841_v45, 0.0  ;;  %v613_v50 = vpop.f32.mrb[28].mxu0  ;;  %v1360_v45 = vld [vmem:[#allocation9 + $0x18] sm:$0xff] }
 0x19c   :  { %v778_v51 = vmul.f32 %v2353_v24, %v613_v50  ;;  %v615_v52 = vpop.f32.mrb[29].mxu0  ;;  %v909_v53 = vpack.c.bf16 %v888_v23, %v885_v46  ;;  %v1361_v46 = vld [vmem:[#allocation9 + $0x20] sm:$0xff]  ;;  %v1362_v23 = vld [vmem:[#allocation9 + $0x28] sm:$0xff] }
 0x19d   :  { %v779_v54 = vmul.f32 %v2357_v25, %v615_v52  ;;  %v617_v55 = vpop.f32.mrb[30].mxu0  ;;  %v910_v56 = vpack.c.bf16 %v889_v48, %v886_v47  ;;  %v1357_v47 = vld [vmem:[#allocation9] sm:$0xff]  ;;  %v1358_v48 = vld [vmem:[#allocation9 + $0x8] sm:$0xff] }
 0x19e   :  { %v843_v57 = vadd.f32 %v2361_v26, %v778_v51  ;;  %v781_v58 = vmul.f32 %v2353_v24, %v617_v55  ;;  %v619_v60 = vpop.f32.mrb[31].mxu0 }
 0x19f   :  { %v844_v61 = vadd.f32 %v2365_v28, %v779_v54  ;;  %v782_v62 = vmul.f32 %v2357_v25, %v619_v60  ;;  %1121 = vmatprep.mubr.bf16.mxu1 %v910_v56  ;;  %v2470_v56 = vld [vmem:[#allocation9 + $0x30] sm:$0xff] }
 0x1a0   :  { %v891_v63 = vmax.f32 %v843_v57, 0.0  ;;  %v846_v0 = vadd.f32 %v2361_v26, %v781_v58  ;;  %1122 = vmatmul.mubr.bf16.gmra.mrb[48].mxu1 %v909_v53  ;;  %v2472_v57 = vld [vmem:[#allocation9 + $0x38] sm:$0xff] }
 0x1a1   :  { %v892_v1 = vmax.f32 %v844_v61, 0.0  ;;  %v847_v2 = vadd.f32 %v2365_v28, %v782_v62  ;;  %v2474_v61 = vld [vmem:[#allocation9 + $0x40] sm:$0xff]  ;;  %v2476_v62 = vld [vmem:[#allocation9 + $0x48] sm:$0xff] }
 0x1a2   :  { %v894_v4 = vmax.f32 %v846_v0, 0.0 }
 0x1a3   :  { %v895_v6 = vmax.f32 %v847_v2, 0.0  ;;  %v1721_v7 = vpop.f32.mrb[32].mxu0 }
 0x1a4   :  { %v911_v8 = vpack.c.bf16 %v894_v4, %v891_v63  ;;  %v1722_v9 = vpop.f32.mrb[33].mxu0 }
 0x1a5   :  { %v912_v10 = vpack.c.bf16 %v895_v6, %v892_v1  ;;  %v1723_v24 = vadd.f32 %v1722_v9, %v1721_v7  ;;  %v1724_v11 = vpop.f32.mrb[34].mxu0 }
 0x1a6   :  { %v1725_v12 = vpop.f32.mrb[35].mxu0 }
 0x1a7   :  { %1129 = vmatprep.mubr.bf16.mxu1 %v912_v10  ;;  %v738_v25 = vmul.f32 %v1723_v24, %v2395_v30  ;;  %v1726_v15 = vadd.f32 %v1725_v12, %v1724_v11 }
 0x1a8   :  { %1130 = vmatmul.mubr.bf16.gmra.mrb[52].mxu1 %v911_v8 }
 0x1a9   :  { %v741_v26 = vmul.f32 %v1726_v15, %v2395_v30  ;;  %v803_v16 = vadd.f32 %v2400_v37, %v738_v25 }
 0x1ab   :  { %v1727_v17 = vpop.f32.mrb[36].mxu0  ;;  %v851_v28 = vmax.f32 %v803_v16, 0.0  ;;  %v806_v18 = vadd.f32 %v2400_v37, %v741_v26 }
 0x1ac   :  { %v1728_v27 = vpop.f32.mrb[37].mxu0 }
 0x1ad   :  { %v1729_v29 = vadd.f32 %v1728_v27, %v1727_v17  ;;  %1375 = vperm.xlu1 %1864, %v851_v28   ;;  %v1730_v31 = vpop.f32.mrb[38].mxu0  ;;  %v854_v14 = vmax.f32 %v806_v18, 0.0 }
 0x1ae   :  { %v1731_v32 = vpop.f32.mrb[39].mxu0 }
 0x1af   :  { %v744_v33 = vmul.f32 %v1729_v29, %v2395_v30  ;;  %v1732_v34 = vadd.f32 %v1731_v32, %v1730_v31 }
 0x1b1   :  { %v747_v36 = vmul.f32 %v1732_v34, %v2395_v30  ;;  %1380 = vperm.xlu1 %1864, %v854_v14   ;;  %v809_v38 = vadd.f32 %v2400_v37, %v744_v33  ;;  %v2491_v34 = vand.u32 127, %v721_v19 }
 0x1b3   :  { %v857_v39 = vmax.f32 %v809_v38, 0.0  ;;  %v812_v40 = vadd.f32 %v2400_v37, %v747_v36  ;;  %vm1140_vm0 = vcmp.lt.s32.totalorder %v2491_v34, 73 }
 0x1b5   :  { %1385 = vperm.xlu1 %1864, %v857_v39   ;;  %v860_v21 = vmax.f32 %v812_v40, 0.0 }
 0x1b9   :  { %1390 = vperm.xlu1 %1864, %v860_v21  }
 0x1f0   :  { %v1421_v41 = vpop.permute.xlu1 %1420 }
 0x1f1   :  { %v1471_v50 = vmul.f32 %v1421_v41, %v1359_v44  ;;  %v1472_v51 = vmul.f32 %v1421_v41, %v1360_v45  ;;  %v1416_v53 = vpop.permute.xlu0 %1415 }
 0x1f2   :  { %v1469_v58 = vmul.f32 %v1416_v53, %v1357_v47  ;;  %v1470_v60 = vmul.f32 %v1416_v53, %v1358_v48 }
 0x1f4   :  { %v1511_v63 = vadd.f32 %v1471_v50, %v1469_v58  ;;  %v1524_v0 = vadd.f32 %v1472_v51, %v1470_v60 }
 0x1f9   :  { %v1426_v42 = vpop.permute.xlu1 %1425 }
 0x1fa   :  { %v1473_v54 = vmul.f32 %v1426_v42, %v1361_v46  ;;  %v1474_v55 = vmul.f32 %v1426_v42, %v1362_v23 }
 0x1fc   :  { %v1512_v6 = vadd.f32 %v1511_v63, %v1473_v54  ;;  %v1525_v7 = vadd.f32 %v1524_v0, %v1474_v55 }
 0x1fd   :  { %v1431_v52 = vpop.permute.xlu1 %1430 }
 0x1fe   :  { %v1475_v1 = vmul.f32 %v1431_v52, %v2470_v56  ;;  %v1476_v2 = vmul.f32 %v1431_v52, %v2472_v57 }
 0x200   :  { %v1513_v10 = vadd.f32 %v1512_v6, %v1475_v1  ;;  %v1526_v24 = vadd.f32 %v1525_v7, %v1476_v2 }
 0x202   :  { %v1436_v4 = vpop.permute.xlu1 %1435 }
 0x203   :  { %v1477_v8 = vmul.f32 %v1436_v4, %v2474_v61  ;;  %v1478_v9 = vmul.f32 %v1436_v4, %v2476_v62 }
 0x205   :  { %v2482_v11 = vadd.f32 %v1513_v10, %v1477_v8  ;;  %v2484_v12 = vadd.f32 %v1526_v24, %v1478_v9 }
 0x22c   :  { %v1376_v25 = vpop.permute.xlu1 %1375 }
 0x22d   :  { %v1453_v15 = vmul.f32 %v1376_v25, %v1357_v47  ;;  %v1454_v26 = vmul.f32 %v1376_v25, %v1358_v48 }
 0x230   :  { %v1381_v16 = vpop.permute.xlu1 %1380 }
 0x231   :  { %v1455_v17 = vmul.f32 %v1381_v16, %v1359_v44  ;;  %v1456_v28 = vmul.f32 %v1381_v16, %v1360_v45 }
 0x233   :  { %v1485_v18 = vadd.f32 %v1455_v17, %v1453_v15  ;;  %v1498_v27 = vadd.f32 %v1456_v28, %v1454_v26 }
 0x234   :  { %v1386_v29 = vpop.permute.xlu1 %1385 }
 0x235   :  { %v1457_v31 = vmul.f32 %v1386_v29, %v1361_v46  ;;  %v1458_v14 = vmul.f32 %v1386_v29, %v1362_v23 }
 0x237   :  { %v2486_v32 = vadd.f32 %v1485_v18, %v1457_v31  ;;  %v2488_v33 = vadd.f32 %v1498_v27, %v1458_v14 }
 0x243   :  { %v1785_v36 = vpop.f32.mrb[24].mxu1 }
 0x244   :  { %v1786_v38 = vpop.f32.mrb[25].mxu1 }
 0x245   :  { %v1787_v39 = vadd.f32 %v1786_v38, %v1785_v36  ;;  %v1788_v40 = vpop.f32.mrb[26].mxu1 }
 0x246   :  { %v1789_v21 = vpop.f32.mrb[27].mxu1 }
 0x247   :  { %v1790_v41 = vadd.f32 %v1789_v21, %v1788_v40  ;;  %v2496_v42 = vsel %vm1140_vm0, %v1787_v39, -1e+30 }
 0x248   :  { %1157 = vmax.xlane.f32.xlu0 %v2496_v42 }
 0x249   :  { %v2501_v45 = vsel %vm1140_vm0, %v1790_v41, -1e+30 }
 0x24b   :  { %v1791_v44 = vpop.f32.mrb[28].mxu1 }
 0x24c   :  { %1159 = vmax.xlane.f32.xlu0 %v2501_v45  ;;  %v1792_v19 = vpop.f32.mrb[29].mxu1 }
 0x24d   :  { %v1793_v46 = vadd.f32 %v1792_v19, %v1791_v44  ;;  %v1794_v23 = vpop.f32.mrb[30].mxu1 }
 0x24e   :  { %v1795_v47 = vpop.f32.mrb[31].mxu1 }
 0x24f   :  { %v1796_v48 = vadd.f32 %v1795_v47, %v1794_v23  ;;  %v2506_v50 = vsel %vm1140_vm0, %v1793_v46, -1e+30 }
 0x250   :  { %1161 = vmax.xlane.f32.xlu1 %v2506_v50 }
 0x251   :  { %v2511_v52 = vsel %vm1140_vm0, %v1796_v48, -1e+30 }
 0x253   :  { %v1797_v51 = vpop.f32.mrb[32].mxu1 }
 0x254   :  { %v1798_v53 = vpop.f32.mrb[33].mxu1  ;;  %1163 = vmax.xlane.f32.xlu1 %v2511_v52 }
 0x255   :  { %v1799_v54 = vadd.f32 %v1798_v53, %v1797_v51  ;;  %v1800_v55 = vpop.f32.mrb[34].mxu1 }
 0x256   :  { %v1801_v58 = vpop.f32.mrb[35].mxu1 }
 0x257   :  { %v1802_v60 = vadd.f32 %v1801_v58, %v1800_v55  ;;  %v2516_v63 = vsel %vm1140_vm0, %v1799_v54, -1e+30 }
 0x258   :  { %1165 = vmax.xlane.f32.xlu0 %v2516_v63 }
 0x259   :  { %v2521_v0 = vsel %vm1140_vm0, %v1802_v60, -1e+30 }
 0x25a   :  { %1167 = vmax.xlane.f32.xlu1 %v2521_v0 }
 0x25b   :  { %v1803_v1 = vpop.f32.mrb[36].mxu1 }
 0x25c   :  { %v1804_v2 = vpop.f32.mrb[37].mxu1 }
 0x25d   :  { %v1805_v4 = vadd.f32 %v1804_v2, %v1803_v1  ;;  %v1806_v6 = vpop.f32.mrb[38].mxu1  ;;  %v777_v2 = vmul.f32 %v2429_v49, %v2395_v30 }
 0x25e   :  { %v1807_v7 = vpop.f32.mrb[39].mxu1 }
 0x25f   :  { %v1808_v8 = vadd.f32 %v1807_v7, %v1806_v6  ;;  %v2526_v9 = vsel %vm1140_vm0, %v1805_v4, -1e+30  ;;  %v842_v6 = vadd.f32 %v2400_v37, %v777_v2 }
 0x260   :  { %1169 = vmax.xlane.f32.xlu0 %v2526_v9 }
 0x261   :  { %v2531_v10 = vsel %vm1140_vm0, %v1808_v8, -1e+30  ;;  %v890_v7 = vmax.f32 %v842_v6, 0.0  ;;  %v750_v8 = vmul.f32 %v2369_v35, %v2395_v30 }
 0x262   :  { %1171 = vmax.xlane.f32.xlu1 %v2531_v10 }
 0x263   :  { %v1809_v24 = vpop.f32.mrb[40].mxu1 }
 0x264   :  { %v1810_v25 = vpop.f32.mrb[41].mxu1 }
 0x265   :  { %v1811_v15 = vadd.f32 %v1810_v25, %v1809_v24  ;;  %v1812_v26 = vpop.f32.mrb[42].mxu1  ;;  %v753_v24 = vmul.f32 %v2375_v43, %v2395_v30  ;;  %v815_v25 = vadd.f32 %v2400_v37, %v750_v8 }
 0x266   :  { %v1813_v16 = vpop.f32.mrb[43].mxu1 }
 0x267   :  { %v1814_v17 = vadd.f32 %v1813_v16, %v1812_v26  ;;  %v2536_v28 = vsel %vm1140_vm0, %v1811_v15, -1e+30  ;;  %v756_v15 = vmul.f32 %v2381_v59, %v2395_v30  ;;  %v863_v49 = vmax.f32 %v815_v25, 0.0 }
 0x268   :  { %1173 = vmax.xlane.f32.xlu0 %v2536_v28  ;;  %v818_v34 = vadd.f32 %v2400_v37, %v753_v24  ;;  %v759_v26 = vmul.f32 %v2387_v3, %v2395_v30  ;;  %v780_v59 = vmul.f32 %v2436_v5, %v2395_v30 }
 0x269   :  { %v2541_v18 = vsel %vm1140_vm0, %v1814_v17, -1e+30  ;;  %v821_v17 = vadd.f32 %v2400_v37, %v756_v15 }
 0x26a   :  { %1175 = vmax.xlane.f32.xlu1 %v2541_v18  ;;  %v866_v16 = vmax.f32 %v818_v34, 0.0  ;;  %v845_v3 = vadd.f32 %v2400_v37, %v780_v59 }
 0x26b   :  { %v1815_v27 = vpop.f32.mrb[44].mxu1  ;;  %v869_v35 = vmax.f32 %v821_v17, 0.0 }
 0x26c   :  { %v1816_v29 = vpop.f32.mrb[45].mxu1 }
 0x26d   :  { %v1817_v31 = vadd.f32 %v1816_v29, %v1815_v27  ;;  %v1818_v14 = vpop.f32.mrb[46].mxu1  ;;  %v824_v27 = vadd.f32 %v2400_v37, %v759_v26  ;;  %v783_v29 = vmul.f32 %v2442_v13, %v2395_v30 }
 0x26e   :  { %v1819_v36 = vpop.f32.mrb[47].mxu1 }
 0x26f   :  { %v1820_v38 = vadd.f32 %v1819_v36, %v1818_v14  ;;  %v2546_v39 = vsel %vm1140_vm0, %v1817_v31, -1e+30  ;;  %v872_v43 = vmax.f32 %v824_v27, 0.0  ;;  %v893_v31 = vmax.f32 %v845_v3, 0.0 }
 0x270   :  { %1177 = vmax.xlane.f32.xlu0 %v2546_v39  ;;  %v848_v14 = vadd.f32 %v2400_v37, %v783_v29 }
 0x271   :  { %v2551_v40 = vsel %vm1140_vm0, %v1820_v38, -1e+30  ;;  %v1391_v38 = vpop.permute.xlu1 %1390 }
 0x272   :  { %1179 = vmax.xlane.f32.xlu1 %v2551_v40  ;;  %v896_v36 = vmax.f32 %v848_v14, 0.0 }
 0x273   :  { %v1821_v21 = vpop.f32.mrb[48].mxu1 }
 0x274   :  { %v1822_v41 = vpop.f32.mrb[49].mxu1 }
 0x275   :  { %v1823_v44 = vadd.f32 %v1822_v41, %v1821_v21  ;;  %v1824_v19 = vpop.f32.mrb[50].mxu1 }
 0x276   :  { %v1825_v46 = vpop.f32.mrb[51].mxu1 }
 0x277   :  { %v1826_v23 = vadd.f32 %v1825_v46, %v1824_v19  ;;  %v2556_v47 = vsel %vm1140_vm0, %v1823_v44, -1e+30 }
 0x278   :  { %1181 = vmax.xlane.f32.xlu0 %v2556_v47 }
 0x279   :  { %v2561_v48 = vsel %vm1140_vm0, %v1826_v23, -1e+30 }
 0x27a   :  { %1183 = vmax.xlane.f32.xlu1 %v2561_v48 }
 0x27b   :  { %v1827_v51 = vpop.f32.mrb[52].mxu1 }
 0x27c   :  { %v1828_v53 = vpop.f32.mrb[53].mxu1 }
 0x27d   :  { %v1829_v54 = vadd.f32 %v1828_v53, %v1827_v51  ;;  %v1830_v55 = vpop.f32.mrb[54].mxu1 }
 0x27e   :  { %v1831_v58 = vpop.f32.mrb[55].mxu1 }
 0x27f   :  { %v2566_v60 = vsel %vm1140_vm0, %v1829_v54, -1e+30  ;;  %v1832_v1 = vadd.f32 %v1831_v58, %v1830_v55 }
 0x280   :  { %1185 = vmax.xlane.f32.xlu0 %v2566_v60 }
 0x281   :  { %v2573_v4 = vsel %vm1140_vm0, %v1832_v1, -1e+30 }
 0x28b   :  { %1440 = vperm.xlu1 %1864, %v890_v7  }
 0x296   :  { %1395 = vperm.xlu0 %1863, %v863_v49  }
 0x29a   :  { %1400 = vperm.xlu0 %1863, %v866_v16  }
 0x29e   :  { %1405 = vperm.xlu0 %1863, %v869_v35  }
 0x2a2   :  { %1410 = vperm.xlu0 %1863, %v872_v43  }
 0x2af   :  { %1187 = vmax.xlane.f32.xlu1 %v2573_v4 }
 0x2c0   :  { %1445 = vperm.xlu1 %1864, %v893_v31  }
 0x2c4   :  { %1450 = vperm.xlu1 %1864, %v896_v36  }
 0x2d5   :  { %v1158_v21 = vpop.xlane.xlu0 %1157 }
 0x2d9   :  { %v1160_v44 = vpop.xlane.xlu0 %1159 }
 0x2dd   :  { %v1162_v41 = vpop.xlane.xlu1 %1161 }
 0x2de   :  { %v1189_v51 = vmax.f32 %v1158_v21, %v1162_v41  ;;  %v1459_v41 = vmul.f32 %v1391_v38, %v2470_v56  ;;  %v1372_v56 = vld [vmem:[#allocation9 + $0x78] sm:$0xff] }
 0x2e1   :  { %v1164_v19 = vpop.xlane.xlu1 %1163 }
 0x2e2   :  { %v1190_v5 = vmax.f32 %v1160_v44, %v1164_v19  ;;  %v1460_v44 = vmul.f32 %v1391_v38, %v2472_v57 }
 0x2e5   :  { %v1166_v46 = vpop.xlane.xlu0 %1165 }
 0x2e6   :  { %v1191_v54 = vmax.f32 %v1189_v51, %v1166_v46  ;;  %v1367_v46 = vld [vmem:[#allocation9 + $0x50] sm:$0xff] }
 0x2e7   :  { %v1168_v23 = vpop.xlane.xlu1 %1167 }
 0x2e8   :  { %v1192_v30 = vmax.f32 %v1190_v5, %v1168_v23  ;;  %v1368_v5 = vld [vmem:[#allocation9 + $0x58] sm:$0xff] }
 0x2ed   :  { %v1170_v53 = vpop.xlane.xlu0 %1169 }
 0x2ee   :  { %v1193_v55 = vmax.f32 %v1191_v54, %v1170_v53  ;;  %v1369_v53 = vld [vmem:[#allocation9 + $0x60] sm:$0xff]  ;;  %v1370_v54 = vld [vmem:[#allocation9 + $0x68] sm:$0xff] }
 0x2ef   :  { %v1172_v13 = vpop.xlane.xlu1 %1171 }
 0x2f0   :  { %v1194_v58 = vmax.f32 %v1192_v30, %v1172_v13  ;;  %v1487_v30 = vadd.f32 %v2486_v32, %v1459_v41  ;;  %v1500_v13 = vadd.f32 %v2488_v33, %v1460_v44 }
 0x2f2   :  { %v1195_v1 = vmax.f32 %v1193_v55, %v1194_v58 }
 0x2f4   :  { %v1196_v37 = vrot.slane %v1195_v1, 4 }
 0x2f5   :  { %v1174_v35 = vpop.xlane.xlu0 %1173 }
 0x2f6   :  { %v1197_v2 = vmax.f32 %v1195_v1, %v1196_v37  ;;  %v1371_v37 = vld [vmem:[#allocation9 + $0x70] sm:$0xff] }
 0x2f7   :  { %v1176_v19 = vpop.xlane.xlu1 %1175 }
 0x2f8   :  { %v1198_v6 = vrot.slane %v1197_v2, 2 }
 0x2fa   :  { %v1199_v7 = vmax.f32 %v1197_v2, %v1198_v6 }
 0x2fc   :  { %v1200_v8 = vrot.slane %v1199_v7, 1 }
 0x2fd   :  { %v1178_v59 = vpop.xlane.xlu0 %1177 }
 0x2fe   :  { %v2595_v24 = vmax.f32 %v1199_v7, %v1200_v8 }
 0x2ff   :  { %v1180_v55 = vpop.xlane.xlu1 %1179 }
 0x300   :  { %v2599_v25 = vsub.f32 %v2501_v45, %v2595_v24  ;;  %v2603_v15 = vsub.f32 %v2496_v42, %v2595_v24  ;;  %v2607_v49 = vsub.f32 %v2506_v50, %v2595_v24  ;;  %v2614_v17 = vsub.f32 %v2511_v52, %v2595_v24 }
 0x301   :  { %v2619_v45 = vsub.f32 %v2516_v63, %v2595_v24 }
 0x302   :  { %v1233_v34 = vmul.f32 1.442695, %v2599_v25  ;;  %v1231_v26 = vmul.f32 1.442695, %v2603_v15  ;;  %v1235_v16 = vmul.f32 1.442695, %v2607_v49 }
 0x303   :  { %v1237_v42 = vmul.f32 1.442695, %v2614_v17  ;;  %v1239_v50 = vmul.f32 1.442695, %v2619_v45 }
 0x304   :  { %1969 = vpow2.f32 %v1233_v34 }
 0x305   :  { %1971 = vpow2.f32 %v1231_v26  ;;  %v1182_v29 = vpop.xlane.xlu0 %1181 }
 0x306   :  { %1973 = vpow2.f32 %v1235_v16 }
 0x307   :  { %1975 = vpow2.f32 %v1237_v42 }
 0x308   :  { %1977 = vpow2.f32 %v1239_v50 }
 0x30d   :  { %v1186_v31 = vpop.xlane.xlu0 %1185 }
 0x30e   :  { %v1970_v27 = vpop.eup %1969 }
 0x30f   :  { %v1972_v43 = vpop.eup %1971  ;;  %1265 = vadd.xlane.f32.xlu0 %v1970_v27  ;;  %v1202_v27 = vmax.f32 %v1174_v35, %v1178_v59 }
 0x310   :  { %1263 = vadd.xlane.f32.xlu1 %v1972_v43  ;;  %v1974_v52 = vpop.eup %1973  ;;  %v1203_v43 = vmax.f32 %v1176_v19, %v1180_v55 }
 0x311   :  { %v1976_v3 = vpop.eup %1975 }
 0x312   :  { %v1978_v14 = vpop.eup %1977 }
 0x313   :  { %1267 = vadd.xlane.f32.xlu0 %v1974_v52 }
 0x315   :  { %v1396_v63 = vpop.permute.xlu0 %1395 }
 0x316   :  { %v1461_v23 = vmul.f32 %v1396_v63, %v2474_v61  ;;  %v1462_v51 = vmul.f32 %v1396_v63, %v2476_v62  ;;  %v1184_v61 = vpop.xlane.xlu1 %1183 }
 0x317   :  { %1269 = vadd.xlane.f32.xlu0 %v1976_v3  ;;  %v1205_v63 = vmax.f32 %v1203_v43, %v1184_v61 }
 0x318   :  { %v1488_v57 = vadd.f32 %v1487_v30, %v1461_v23  ;;  %v1501_v38 = vadd.f32 %v1500_v13, %v1462_v51 }
 0x319   :  { %v1401_v36 = vpop.permute.xlu0 %1400 }
 0x31a   :  { %v1463_v58 = vmul.f32 %v1401_v36, %v1367_v46  ;;  %v1464_v1 = vmul.f32 %v1401_v36, %v1368_v5  ;;  %v1441_v33 = vpop.permute.xlu1 %1440 }
 0x31b   :  { %1271 = vadd.xlane.f32.xlu0 %v1978_v14  ;;  %v1204_v14 = vmax.f32 %v1202_v27, %v1182_v29  ;;  %v1480_v30 = vmul.f32 %v1441_v33, %v1368_v5 }
 0x31c   :  { %v1489_v8 = vadd.f32 %v1488_v57, %v1463_v58  ;;  %v1502_v62 = vadd.f32 %v1501_v38, %v1464_v1 }
 0x31d   :  { %v1406_v21 = vpop.permute.xlu0 %1405  ;;  %v1206_v41 = vmax.f32 %v1204_v14, %v1186_v31  ;;  %v1528_v19 = vadd.f32 %v2484_v12, %v1480_v30 }
 0x31e   :  { %v1465_v6 = vmul.f32 %v1406_v21, %v1369_v53  ;;  %v1466_v7 = vmul.f32 %v1406_v21, %v1370_v54  ;;  %v1479_v21 = vmul.f32 %v1441_v33, %v1367_v46 }
 0x320   :  { %v1490_v16 = vadd.f32 %v1489_v8, %v1465_v6  ;;  %v1503_v42 = vadd.f32 %v1502_v62, %v1466_v7  ;;  %v1515_v38 = vadd.f32 %v2482_v11, %v1479_v21  ;;  %v1537_v11 = vld [vmem:[%s2739_s6] sm:$0x3] }
 0x321   :  { %v1411_v2 = vpop.permute.xlu0 %1410 }
 0x322   :  { %v1467_v34 = vmul.f32 %v1411_v2, %v1371_v37  ;;  %v1468_v26 = vmul.f32 %v1411_v2, %v1372_v56 }
 0x324   :  { %v1491_v32 = vadd.f32 %v1490_v16, %v1467_v34  ;;  %v1504_v50 = vadd.f32 %v1503_v42, %v1468_v26 }
 0x326   :  { %v1492_v52 = vrot.slane %v1491_v32, 4  ;;  %v1505_v3 = vrot.slane %v1504_v50, 4 }
 0x328   :  { %v1493_v23 = vadd.f32 %v1492_v52, %v1491_v32  ;;  %v1506_v51 = vadd.f32 %v1505_v3, %v1504_v50 }
 0x32a   :  { %v1494_v35 = vrot.slane %v1493_v23, 2  ;;  %v1507_v59 = vrot.slane %v1506_v51, 2 }
 0x32c   :  { %v1495_v8 = vadd.f32 %v1494_v35, %v1493_v23  ;;  %v1508_v5 = vadd.f32 %v1507_v59, %v1506_v51 }
 0x32e   :  { %v1496_v12 = vrot.slane %v1495_v8, 1  ;;  %v1509_v42 = vrot.slane %v1508_v5, 1 }
 0x330   :  { %v1497_v14 = vadd.f32 %v1496_v12, %v1495_v8 }
 0x33c   :  { %v1188_v36 = vpop.xlane.xlu1 %1187 }
 0x33d   :  { %v1207_v44 = vmax.f32 %v1205_v63, %v1188_v36  ;;  %v1510_v63 = vadd.f32 %v1509_v42, %v1508_v5 }
 0x33f   :  { %v1208_v13 = vmax.f32 %v1206_v41, %v1207_v44  ;;  %v2651_v41 = vsub.f32 %v2521_v0, %v2595_v24  ;;  %v1557_v0 = vld [vmem:[%s2740_s7] sm:$0x3] }
 0x340   :  { %v1446_v58 = vpop.permute.xlu1 %1445  ;;  %v1562_v35 = vrot.slane %v1557_v0, %v2336_v20 }
 0x341   :  { %v1209_v1 = vrot.slane %v1208_v13, 4  ;;  %v1481_v2 = vmul.f32 %v1446_v58, %v1369_v53  ;;  %v1482_v57 = vmul.f32 %v1446_v58, %v1370_v54  ;;  %v2666_v58 = vsub.f32 %v2526_v9, %v2595_v24 }
 0x342   :  { %v2677_v9 = vsub.f32 %v2531_v10, %v2595_v24 }
 0x343   :  { %v1210_v29 = vmax.f32 %v1208_v13, %v1209_v1  ;;  %v1516_v55 = vadd.f32 %v1515_v38, %v1481_v2  ;;  %v1529_v7 = vadd.f32 %v1528_v19, %v1482_v57  ;;  %v1241_v13 = vmul.f32 1.442695, %v2651_v41 }
 0x344   :  { %v1451_v6 = vpop.permute.xlu1 %1450 }
 0x345   :  { %v1211_v31 = vrot.slane %v1210_v29, 2  ;;  %v1483_v46 = vmul.f32 %v1451_v6, %v1371_v37  ;;  %v1484_v61 = vmul.f32 %v1451_v6, %v1372_v56  ;;  %v1542_v37 = vrot.slane %v1537_v11, %v2336_v20 }
 0x346   :  { %v1546_v56 = vrot.slane %v1537_v11, %v2344_v22  ;;  %v1566_v6 = vrot.slane %v1557_v0, %v2344_v22 }
 0x347   :  { %v1212_v62 = vmax.f32 %v1210_v29, %v1211_v31  ;;  %v1517_v34 = vadd.f32 %v1516_v55, %v1483_v46  ;;  %v1530_v26 = vadd.f32 %v1529_v7, %v1484_v61  ;;  %v1243_v55 = vmul.f32 1.442695, %v2666_v58 }
 0x348   :  { %v1550_v57 = vadd.f32 %v1546_v56, %v1510_v63 }
 0x349   :  { %v1213_v53 = vrot.slane %v1212_v62, 1  ;;  %v1518_v54 = vrot.slane %v1517_v34, 4  ;;  %v1531_v16 = vrot.slane %v1530_v26, 4 }
 0x34a   :  { %v1554_v7 = vmax.f32 %v1550_v57, 0.0 }
 0x34b   :  { %v2633_v32 = vmax.f32 %v1212_v62, %v1213_v53  ;;  %v1519_v50 = vadd.f32 %v1518_v54, %v1517_v34  ;;  %v1532_v33 = vadd.f32 %v1531_v16, %v1530_v26  ;;  %v1245_v62 = vmul.f32 1.442695, %v2677_v9 }
 0x34c   :  { %v1570_v24 = vmul.f32 %v1566_v6, %v1554_v7 }
 0x34d   :  { %v1520_v27 = vrot.slane %v1519_v50, 2  ;;  %v1533_v43 = vrot.slane %v1532_v33, 2  ;;  %v2639_v52 = vsub.f32 %v2541_v18, %v2633_v32  ;;  %v2643_v3 = vsub.f32 %v2536_v28, %v2633_v32 }
 0x34e   :  { %v2647_v36 = vsub.f32 %v2546_v39, %v2633_v32  ;;  %v2657_v28 = vsub.f32 %v2551_v40, %v2633_v32  ;;  %v1549_v40 = vadd.f32 %v1542_v37, %v1497_v14  ;;  %v2670_v38 = vsub.f32 %v2556_v47, %v2633_v32 }
 0x34f   :  { %v1521_v44 = vadd.f32 %v1520_v27, %v1519_v50  ;;  %v1534_v21 = vadd.f32 %v1533_v43, %v1532_v33  ;;  %v1249_v23 = vmul.f32 1.442695, %v2639_v52  ;;  %v1247_v18 = vmul.f32 1.442695, %v2643_v3 }
 0x350   :  { %v1251_v39 = vmul.f32 1.442695, %v2647_v36  ;;  %v1253_v59 = vmul.f32 1.442695, %v2657_v28  ;;  %v1553_v31 = vmax.f32 %v1549_v40, 0.0  ;;  %v2682_v20 = vsub.f32 %v2561_v48, %v2633_v32 }
 0x351   :  { %v1522_v51 = vrot.slane %v1521_v44, 1  ;;  %v1535_v30 = vrot.slane %v1534_v21, 1  ;;  %1979 = vpow2.f32 %v1249_v23  ;;  %v1255_v61 = vmul.f32 1.442695, %v2670_v38 }
 0x352   :  { %1981 = vpow2.f32 %v1247_v18  ;;  %v1569_v22 = vmul.f32 %v1562_v35, %v1553_v31  ;;  %v2688_v48 = vsub.f32 %v2566_v60, %v2633_v32  ;;  %v1257_v54 = vmul.f32 1.442695, %v2682_v20 }
 0x353   :  { %v1523_v1 = vadd.f32 %v1522_v51, %v1521_v44  ;;  %v1536_v2 = vadd.f32 %v1535_v30, %v1534_v21  ;;  %1983 = vpow2.f32 %v1251_v39 }
 0x354   :  { %1985 = vpow2.f32 %v1241_v13  ;;  %v1259_v60 = vmul.f32 1.442695, %v2688_v48 }
 0x355   :  { %v1551_v19 = vadd.f32 %v1542_v37, %v1523_v1  ;;  %v1552_v29 = vadd.f32 %v1546_v56, %v1536_v2  ;;  %1987 = vpow2.f32 %v1253_v59  ;;  %v2696_v56 = vsub.f32 %v2573_v4, %v2633_v32 }
 0x356   :  { %1989 = vpow2.f32 %v1243_v55 }
 0x357   :  { %v1555_v47 = vmax.f32 %v1551_v19, 0.0  ;;  %v1556_v46 = vmax.f32 %v1552_v29, 0.0  ;;  %1991 = vpow2.f32 %v1255_v61  ;;  %v1261_v14 = vmul.f32 1.442695, %v2696_v56 }
 0x358   :  { %1993 = vpow2.f32 %v1245_v62 }
 0x359   :  { %v1571_v8 = vmul.f32 %v1562_v35, %v1555_v47  ;;  %v1572_v5 = vmul.f32 %v1566_v6, %v1556_v46  ;;  %1995 = vpow2.f32 %v1257_v54 }
 0x35a   :  { %1997 = vpow2.f32 %v1259_v60 }
 0x35b   :  { %v1980_v10 = vpop.eup %1979  ;;  %v1577_v34 = vrot.slane %v1571_v8, 7  ;;  %v1580_v26 = vrot.slane %v1572_v5, 7  ;;  %1999 = vpow2.f32 %v1261_v14  ;;  %v1704_v8 = vld [vmem:[#allocation2] ss:$0 sm:$0xff] }
 0x35c   :  { %v1982_v53 = vpop.eup %1981  ;;  %1281 = vadd.xlane.f32.xlu1 %v1980_v10 }
 0x35d   :  { %1279 = vadd.xlane.f32.xlu0 %v1982_v53  ;;  %v1579_v16 = vsel %vm1578_vm1, %v1577_v34, %v1569_v22  ;;  %v1581_v11 = vsel %vm1578_vm1, %v1580_v26, %v1570_v24  ;;  %v1984_v50 = vpop.eup %1983 }
 0x35e   :  { %v1585_v12 = vsel %vm1584_vm2, %v1579_v16, 0.0  ;;  %v1586_v42 = vsel %vm1584_vm2, %v1581_v11, 0.0  ;;  %v1986_v37 = vpop.eup %1985 }
 0x35f   :  { %v1587_v33 = vadd.f32 %v1586_v42, %v1585_v12  ;;  %v1988_v27 = vpop.eup %1987 }
 0x360   :  { %1283 = vadd.xlane.f32.xlu1 %v1984_v50  ;;  %v1990_v43 = vpop.eup %1989 }
 0x361   :  { %1273 = vadd.xlane.f32.xlu0 %v1986_v37  ;;  %v1992_v63 = vpop.eup %1991 }
 0x362   :  { %v1994_v44 = vpop.eup %1993 }
 0x363   :  { %v1996_v21 = vpop.eup %1995 }
 0x364   :  { %1285 = vadd.xlane.f32.xlu1 %v1988_v27  ;;  %v1998_v23 = vpop.eup %1997 }
 0x365   :  { %1275 = vadd.xlane.f32.xlu0 %v1990_v43  ;;  %v2000_v18 = vpop.eup %1999 }
 0x368   :  { %1287 = vadd.xlane.f32.xlu1 %v1992_v63 }
 0x369   :  { %1277 = vadd.xlane.f32.xlu0 %v1994_v44 }
 0x36c   :  { %1289 = vadd.xlane.f32.xlu1 %v1996_v21 }
 0x36d   :  { %1588 = vadd.xlane.f32.xlu0 %v1587_v33 }
 0x370   :  { %1291 = vadd.xlane.f32.xlu1 %v1998_v23 }
 0x374   :  { %1293 = vadd.xlane.f32.xlu1 %v2000_v18 }
 0x39c   :  { %v1266_v4 = vpop.xlane.xlu0 %1265 }
 0x39d   :  { %v1264_v30 = vpop.xlane.xlu1 %1263 }
 0x39e   :  { %v1295_v1 = vadd.f32 %v1266_v4, %v1264_v30 }
 0x3a0   :  { %v1268_v32 = vpop.xlane.xlu0 %1267 }
 0x3a1   :  { %v1296_v2 = vadd.f32 %v1295_v1, %v1268_v32 }
 0x3a4   :  { %v1270_v51 = vpop.xlane.xlu0 %1269 }
 0x3a5   :  { %v1297_v35 = vadd.f32 %v1296_v2, %v1270_v51 }
 0x3a8   :  { %v1272_v39 = vpop.xlane.xlu0 %1271 }
 0x3a9   :  { %v1298_v59 = vadd.f32 %v1297_v35, %v1272_v39 }
 0x3e9   :  { %v1282_v0 = vpop.xlane.xlu1 %1281 }
 0x3ea   :  { %v1280_v13 = vpop.xlane.xlu0 %1279 }
 0x3eb   :  { %v1308_v7 = vadd.f32 %v1282_v0, %v1280_v13 }
 0x3ed   :  { %v1284_v40 = vpop.xlane.xlu1 %1283 }
 0x3ee   :  { %v1274_v57 = vpop.xlane.xlu0 %1273  ;;  %v1309_v61 = vadd.f32 %v1308_v7, %v1284_v40 }
 0x3ef   :  { %v1299_v55 = vadd.f32 %v1298_v59, %v1274_v57 }
 0x3f1   :  { %v1286_v19 = vpop.xlane.xlu1 %1285 }
 0x3f2   :  { %v1276_v29 = vpop.xlane.xlu0 %1275  ;;  %v1310_v10 = vadd.f32 %v1309_v61, %v1286_v19 }
 0x3f3   :  { %v1300_v6 = vadd.f32 %v1299_v55, %v1276_v29 }
 0x3f5   :  { %v1288_v31 = vpop.xlane.xlu1 %1287 }
 0x3f6   :  { %v1278_v47 = vpop.xlane.xlu0 %1277  ;;  %v1311_v26 = vadd.f32 %v1310_v10, %v1288_v31 }
 0x3f7   :  { %v1301_v46 = vadd.f32 %v1300_v6, %v1278_v47 }
 0x3f9   :  { %v1302_v5 = vrot.slane %v1301_v46, 4  ;;  %v1290_v62 = vpop.xlane.xlu1 %1289 }
 0x3fa   :  { %v1589_v22 = vpop.xlane.xlu0 %1588  ;;  %v1312_v16 = vadd.f32 %v1311_v26, %v1290_v62 }
 0x3fb   :  { %v1303_v24 = vadd.f32 %v1302_v5, %v1301_v46  ;;  %v1597_v34 = vadd.f32 %v1704_v8, %v1589_v22 }
 0x3fd   :  { %v1304_v53 = vrot.slane %v1303_v24, 2  ;;  %2001 = vtanh.f32 %v1597_v34  ;;  %v1292_v54 = vpop.xlane.xlu1 %1291 }
 0x3fe   :  { %v1313_v12 = vadd.f32 %v1312_v16, %v1292_v54 }
 0x3ff   :  { %v1305_v11 = vadd.f32 %v1304_v53, %v1303_v24 }
 0x401   :  { %v1306_v42 = vrot.slane %v1305_v11, 1  ;;  %v1294_v50 = vpop.xlane.xlu1 %1293 }
 0x402   :  { %v1314_v33 = vadd.f32 %v1313_v12, %v1294_v50 }
 0x403   :  { %v1307_v37 = vadd.f32 %v1306_v42, %v1305_v11 }
 0x404   :  { %v1315_v60 = vrot.slane %v1314_v33, 4 }
 0x405   :  { %2003 = vlog2.f32 %v1307_v37 }
 0x406   :  { %v1316_v27 = vadd.f32 %v1315_v60, %v1314_v33 }
 0x407   :  { %v2002_v43 = vpop.eup %2001 }
 0x408   :  { %1600 = vst.msk [vmem:[%s2743_s10] sm:$0x3] %vm1599_vm3, %v2002_v43  ;;  %v1317_v14 = vrot.slane %v1316_v27, 2  ;;  %s2138_s10 = smov [#allocation11]  }
 0x409   :  { %s1606_s29 = sshll.u32 %s2138_s10, 4  ;;  %s1607_s29 = int_to_ptr.vmem [resolvable:$true] %s1606_s29 }
 0x40a   :  { %v1318_v63 = vadd.f32 %v1317_v14, %v1316_v27  ;;  %s2095_s11 = scalar_lea.vmem %s1607_s29, 2048  ;;  %p2100_p5 = scmp.lt.s32.totalorder %s1607_s29, %s1607_s29 }
 0x40b   :  { %p2096_p4 = scmp.ne.s32.totalorder %s1607_s29, %s2095_s11  ;;  %p2101_p6 = scmp.lt.s32.totalorder %s2095_s11, %s2095_s11 }
 0x40c   :  { %v1319_v44 = vrot.slane %v1318_v63, 1 }
 0x40d   :  { %p2102_p7 = por %p2101_p6, %p2100_p5 }
 0x40e   :  { %v1320_v21 = vadd.f32 %v1319_v44, %v1318_v63 }
 0x40f   :  { %v2004_v23 = vpop.eup %2003  ;;  %p2103_p8 = pnand %p2102_p7, %p2096_p4 }
 0x410   :  { %v1322_v18 = vmul.f32 0.6931472, %v2004_v23  ;;  %2005 = vlog2.f32 %v1320_v21 }
 0x412   :  { %v1325_v4 = vsub.f32 %v2603_v15, %v1322_v18  ;;  %v1326_v32 = vsub.f32 %v2599_v25, %v1322_v18  ;;  %v1327_v51 = vsub.f32 %v2607_v49, %v1322_v18  ;;  %v1328_v30 = vsub.f32 %v2614_v17, %v1322_v18 }
 0x413   :  { %v1329_v39 = vsub.f32 %v2619_v45, %v1322_v18  ;;  %v1330_v0 = vsub.f32 %v2651_v41, %v1322_v18  ;;  %v1331_v13 = vsub.f32 %v2666_v58, %v1322_v18  ;;  %v1332_v1 = vsub.f32 %v2677_v9, %v1322_v18 }
 0x414   :  { %1341 = vst [vmem:[#allocation11] sm:$0xff] %v1325_v4  ;;  %1342 = vst [vmem:[#allocation11 + $0x8] sm:$0xff] %v1326_v32 }
 0x415   :  { %1343 = vst [vmem:[#allocation11 + $0x10] sm:$0xff] %v1327_v51  ;;  %1344 = vst [vmem:[#allocation11 + $0x18] sm:$0xff] %v1328_v30 }
 0x416   :  { %1345 = vst [vmem:[#allocation11 + $0x20] sm:$0xff] %v1329_v39  ;;  %1346 = vst [vmem:[#allocation11 + $0x28] sm:$0xff] %v1330_v0 }
 0x417   :  { %1347 = vst [vmem:[#allocation11 + $0x30] sm:$0xff] %v1331_v13  ;;  %1348 = vst [vmem:[#allocation11 + $0x38] sm:$0xff] %v1332_v1 }
 0x41a   :  { %v2006_v25 = vpop.eup %2005 }
 0x41b   :  { %v1324_v15 = vmul.f32 0.6931472, %v2006_v25 }
 0x41d   :  { %v1333_v49 = vsub.f32 %v2643_v3, %v1324_v15  ;;  %v1334_v17 = vsub.f32 %v2639_v52, %v1324_v15  ;;  %v1335_v45 = vsub.f32 %v2647_v36, %v1324_v15  ;;  %v1336_v41 = vsub.f32 %v2657_v28, %v1324_v15 }
 0x41e   :  { %v1337_v58 = vsub.f32 %v2670_v38, %v1324_v15  ;;  %v1338_v9 = vsub.f32 %v2682_v20, %v1324_v15  ;;  %v1339_v2 = vsub.f32 %v2688_v48, %v1324_v15  ;;  %v1340_v40 = vsub.f32 %v2696_v56, %v1324_v15 }
 0x41f   :  { %1349 = vst [vmem:[#allocation11 + $0x40] sm:$0xff] %v1333_v49  ;;  %1350 = vst [vmem:[#allocation11 + $0x48] sm:$0xff] %v1334_v17 }
 0x420   :  { %1351 = vst [vmem:[#allocation11 + $0x50] sm:$0xff] %v1335_v45  ;;  %1352 = vst [vmem:[#allocation11 + $0x58] sm:$0xff] %v1336_v41 }
 0x421   :  { %1353 = vst [vmem:[#allocation11 + $0x60] sm:$0xff] %v1337_v58  ;;  %1354 = vst [vmem:[#allocation11 + $0x68] sm:$0xff] %v1338_v9 }
 0x422   :  { %1355 = vst [vmem:[#allocation11 + $0x70] sm:$0xff] %v1339_v2  ;;  %1356 = vst [vmem:[#allocation11 + $0x78] sm:$0xff] %v1340_v40 }
 0x423   :  { %2106 = shalt.err (!%p2103_p8)
}
 0x424   :  { %s2107_s14 = scalar_lea.hbm %s2742_s9, 2048 }
 0x425   :  { %p2108_p9 = scmp.ne.s32.totalorder %s2742_s9, %s2107_s14  ;;  %p2111_p10 = scmp.lt.u32.totalorder %s2107_s14, %s2742_s9 }
 0x427   :  { %p2113_p11 = pnand %p2111_p10, %p2108_p9 }
 0x429   :  { %2116 = shalt.err (!%p2113_p11)
}
 0x42a   :  { %1612 = dma.vmem_to_hbm [thread:$0]  %s1607_s29, 2048, %s2742_s9, [#allocation5], %s2129_s1, %s2129_s1, %s2130_s16  }
 0x42b   :  { %2123 = dma.done.wait [#allocation5], 2048  }
 0x42c   :  { %2124 = vsyncadd [#allocation5], 4294965248 }
 0x42d   :  { %1620 = vsyncpa [#allocation4], 1 }
 0x42e   :  { %1621 = vsyncpa [#allocation7], 1 }
 0x42f   :  { %1622 = vsyncpa [#allocation10], 1 }
 0x430   :  { %1623 = vsyncpa [#allocation5], 1 }

</bundles_post_ra>
